<compile_context>
chip_gen: v7x
topology: tpu7x:2x2x1
jax: 0.10.0
libtpu: 0.0.40
codegen_flags: <defaults>
</compile_context>

<pallas_src>
import functools

import numpy as np
import jax
import jax.numpy as jnp
from jax.experimental import pallas as pl
from jax.experimental.pallas import tpu as pltpu


# ----------------------------------------------------------------------------
# Fused kernel: multi-layer LSTM + dense + MDN log-mixture normalization.
# ----------------------------------------------------------------------------
def make_mdmrnn_kernel(num_layers, hidden_size, seq_len, batch):
    L, H = num_layers, hidden_size
    T, B = seq_len, batch

    def kernel(*refs):
        x_ref, h0_ref, c0_ref = refs[0], refs[1], refs[2]
        layer_refs = refs[3:3 + 3 * L]          # per layer: W_ih, W_hh, bias
        dense_w_ref = refs[3 + 3 * L]
        dense_b_ref = refs[4 + 3 * L]
        sel_ref = refs[5 + 3 * L]               # (W, W) 0/1 group selector
        islm_ref = refs[6 + 3 * L]              # (1, W) 0/1 logmix-column mask
        y_ref = refs[7 + 3 * L]                 # (N, W) lane-dense output slab
        hf_ref = refs[8 + 3 * L]                # (L, B, H) final hidden
        cf_ref = refs[9 + 3 * L]                # (L, B, H) final cell

        in_seq = x_ref[...]                     # (N, F) layer-0 input sequence
        h_fin, c_fin = [], []

        for l in range(L):
            w_ih_ref = layer_refs[3 * l]
            w_hh_ref = layer_refs[3 * l + 1]
            b_ref = layer_refs[3 * l + 2]

            # (1) Batched input projection for ALL time steps: one MXU matmul
            #     with the bias folded in once (hoisted out of the time loop).
            proj = (jnp.dot(in_seq, w_ih_ref[...],
                            preferred_element_type=jnp.float32) + b_ref[...])
            w_hh = w_hh_ref[...]                # hoisted weight read

            # (2) Sequential recurrence. h/c are register-carried; layer
            #     outputs are accumulated in registers (no per-step VMEM
            #     stores on the critical path).
            h = h0_ref[l]                       # (B, H)
            c = c0_ref[l]
            outs = []
            # TODO(synk): at production T (>~32) switch to a time-chunked
            # lax.fori_loop (partial unroll) with ping-pong VMEM scratches
            # instead of a full trace-time unroll with vreg-resident values.
            for t in range(T):
                gates = (proj[t * B:(t + 1) * B, :]
                         + jnp.dot(h, w_hh, preferred_element_type=jnp.float32))
                # Gate columns are pre-reordered host-side to (i, f, o, g):
                # sigmoid only over the first 3H, tanh only over the last H.
                sg = jax.nn.sigmoid(gates[:, :3 * H])
                g_g = jnp.tanh(gates[:, 3 * H:])
                i_g = sg[:, :H]
                f_g = sg[:, H:2 * H]
                o_g = sg[:, 2 * H:3 * H]
                c = f_g * c + i_g * g_g
                h = o_g * jnp.tanh(c)
                outs.append(h)

            h_fin.append(h)
            c_fin.append(c)
            in_seq = jnp.concatenate(outs, axis=0)   # (N, H) -> next layer

        # Final states written once (single store each), not per step.
        hf_ref[...] = jnp.stack(h_fin, axis=0)
        cf_ref[...] = jnp.stack(c_fin, axis=0)

        # (3) Fused dense projection + MDN log-mixture normalization, emitted
        #     as one lane-dense slab; split/reshape is JAX-side layout glue.
        y = (jnp.dot(in_seq, dense_w_ref[...],
                     preferred_element_type=jnp.float32) + dense_b_ref[...])
        is_lm = islm_ref[...] > 0.5                           # (1, W)
        # Segmented logsumexp over the nm logmix columns of each output group:
        # mask + exp, then a (W, W) 0/1 selector matmul broadcasts each group
        # sum back onto its own logmix columns (MXU slot; no narrow slices, no
        # XLU reductions, no masked stores).
        lm_exp = jnp.exp(jnp.where(is_lm, y, -1e30))          # 0 off logmix cols
        group_sum = jnp.dot(lm_exp, sel_ref[...],
                            preferred_element_type=jnp.float32)
        group_sum = jnp.where(is_lm, group_sum, 1.0)          # log(1) = 0
        # Exact PyTorch get_mdn_coef semantics (no max-subtraction).
        y_ref[...] = y - jnp.log(group_sum)

    return kernel


# ----------------------------------------------------------------------------
# Host-side parameter prep: reorder PyTorch gate blocks (i,f,g,o) -> (i,f,o,g).
# ----------------------------------------------------------------------------
def prepare_params(layer_params, hidden_size):
    H = hidden_size

    def reorder(m):  # columns [i|f|g|o] -> [i|f|o|g]
        return jnp.concatenate([m[:, :2 * H], m[:, 3 * H:4 * H],
                                m[:, 2 * H:3 * H]], axis=1)

    return [(reorder(w_ih), reorder(w_hh), reorder(b))
            for (w_ih, w_hh, b) in layer_params]


# ----------------------------------------------------------------------------
# Wrapper: one pallas_call + pure layout glue for the MDN coefficient split.
# ----------------------------------------------------------------------------
@functools.partial(jax.jit, static_argnums=(6, 7))
def mdmrnn_forward(x, h0, c0, layer_params, dense_w, dense_b,
                   num_mixtures, output_size):
    """x: (T, B, F) time-major; h0/c0: (L, B, H).  LSTM weights pre-transposed
    to [in_features, 4H] / [H, 4H] with gate order (i, f, o, g) (use
    prepare_params); bias is combined b_ih + b_hh as (1, 4H); dense is
    (H, out), (1, out)."""
    T, B, F = x.shape
    L, _, H = h0.shape
    GW = 3 * num_mixtures
    W = output_size * GW
    N = T * B

    # Host-side constants for the MDN epilogue (pure functions of nm / out).
    col = np.arange(W)
    is_lm_np = (col % GW) < num_mixtures
    sel_np = (is_lm_np[:, None] & is_lm_np[None, :]
              & ((col[:, None] // GW) == (col[None, :] // GW))).astype(np.float32)
    sel = jnp.asarray(sel_np)
    is_lm = jnp.asarray(is_lm_np.reshape(1, W).astype(np.float32))

    flat_w = []
    for (w_ih, w_hh, b) in layer_params:
        flat_w += [w_ih, w_hh, b]

    n_in = 3 + len(flat_w) + 4
    vmem = pltpu.MemorySpace.VMEM
    kernel = make_mdmrnn_kernel(L, H, T, B)

    y, h_fin, c_fin = pl.pallas_call(
        kernel,
        in_specs=[pl.BlockSpec(memory_space=vmem)] * n_in,
        out_specs=(pl.BlockSpec(memory_space=vmem),) * 3,
        out_shape=(
            jax.ShapeDtypeStruct((N, W), jnp.float32),
            jax.ShapeDtypeStruct((L, B, H), jnp.float32),
            jax.ShapeDtypeStruct((L, B, H), jnp.float32),
        ),
    )(x.reshape(N, F), h0, c0, *flat_w, dense_w, dense_b, sel, is_lm)

    # Pure layout glue: PyTorch z.view(-1, 3*nm) + torch.split(..., nm, dim=1).
    y = y.reshape(N * output_size, 3 * num_mixtures)
    logmix = y[:, :num_mixtures]
    mean = y[:, num_mixtures:2 * num_mixtures]
    logstd = y[:, 2 * num_mixtures:]
    return logmix, mean, logstd, h_fin, c_fin


# ----------------------------------------------------------------------------
# Pure-JAX reference (mirrors the PyTorch forward, PyTorch gate order i,f,g,o).
# ----------------------------------------------------------------------------
def reference_forward(x, h0, c0, layer_params, dense_w, dense_b,
                      num_mixtures, output_size):
    T, B, F = x.shape
    L, _, H = h0.shape
    h = [h0[l] for l in range(L)]
    c = [c0[l] for l in range(L)]
    zs = []
    for t in range(T):
        inp = x[t]
        for l in range(L):
            w_ih, w_hh, b = layer_params[l]
            gates = inp @ w_ih + h[l] @ w_hh + b
            i_g = jax.nn.sigmoid(gates[:, :H])
            f_g = jax.nn.sigmoid(gates[:, H:2 * H])
            g_g = jnp.tanh(gates[:, 2 * H:3 * H])
            o_g = jax.nn.sigmoid(gates[:, 3 * H:])
            c[l] = f_g * c[l] + i_g * g_g
            h[l] = o_g * jnp.tanh(c[l])
            inp = h[l]
        zs.append(inp)
    z = jnp.stack(zs).reshape(-1, H)
    y = z @ dense_w + dense_b
    y = y.reshape(-1, num_mixtures * 3)
    lm = y[:, :num_mixtures]
    mean = y[:, num_mixtures:2 * num_mixtures]
    ls = y[:, 2 * num_mixtures:]
    lm = lm - jnp.log(jnp.sum(jnp.exp(lm), axis=1, keepdims=True))
    return lm, mean, ls, jnp.stack(h), jnp.stack(c)


if __name__ == "__main__":
    # Module hyperparameters (consistent with the PyTorch __init__)
    num_mixtures = 5
    hidden_size = 32
    input_size = 4
    num_layers = 2
    batch_size = 2
    sequence_len = 8
    output_size = 3
    out_dim = output_size * num_mixtures * 3  # dense output width = 45

    key = jax.random.PRNGKey(0)
    keys = jax.random.split(key, 5 + 3 * num_layers)
    k_x, k_h, k_c, k_dw, k_db = keys[:5]
    k_layers = keys[5:]

    scale = 1.0 / jnp.sqrt(hidden_size)

    # Inputs
    x = jax.random.normal(k_x, (sequence_len, batch_size, input_size), jnp.float32)
    h0 = jax.random.normal(k_h, (num_layers, batch_size, hidden_size), jnp.float32)
    c0 = jax.random.normal(k_c, (num_layers, batch_size, hidden_size), jnp.float32)

    # LSTM parameters in PyTorch layout: per layer (W_ih^T, W_hh^T, b_ih+b_hh)
    # with PyTorch gate order (i, f, g, o).
    layer_params = []
    for l in range(num_layers):
        in_l = input_size if l == 0 else hidden_size
        kw1, kw2, kb = k_layers[3 * l], k_layers[3 * l + 1], k_layers[3 * l + 2]
        w_ih = jax.random.uniform(kw1, (in_l, 4 * hidden_size),
                                  minval=-scale, maxval=scale, dtype=jnp.float32)
        w_hh = jax.random.uniform(kw2, (hidden_size, 4 * hidden_size),
                                  minval=-scale, maxval=scale, dtype=jnp.float32)
        b = jax.random.uniform(kb, (1, 4 * hidden_size),
                               minval=-scale, maxval=scale, dtype=jnp.float32)
        layer_params.append((w_ih, w_hh, b))

    # Dense parameters (stored transposed: [H, out_dim])
    dense_w = jax.random.uniform(k_dw, (hidden_size, out_dim),
                                 minval=-scale, maxval=scale, dtype=jnp.float32)
    dense_b = jax.random.uniform(k_db, (1, out_dim),
                                 minval=-scale, maxval=scale, dtype=jnp.float32)

    # Host-side gate-column reorder for the kernel layout (i, f, o, g).
    kernel_layer_params = prepare_params(layer_params, hidden_size)

    outs = mdmrnn_forward(x, h0, c0, kernel_layer_params, dense_w, dense_b,
                          num_mixtures, output_size)
    outs = jax.block_until_ready(outs)

    want = reference_forward(x, h0, c0, layer_params, dense_w, dense_b,
                             num_mixtures, output_size)

    names = ["logmix", "mean", "logstd", "hidden", "cell"]
    for name, got, ref in zip(names, outs, want):
        assert got.shape == ref.shape, (name, got.shape, ref.shape)
        if not jnp.allclose(got, ref, rtol=1e-4, atol=1e-4):
            err = float(jnp.max(jnp.abs(got - ref)))
            raise AssertionError(f"mismatch in {name}: max abs err {err}")

    print("KERNEL_OK")
</pallas_src>

<mosaic_0001>
module attributes {stable_mosaic.version = 11 : i64} {
  func.func @kernel(%arg0: memref<16x4xf32, #tpu.memory_space<vmem>>, %arg1: memref<2x2x32xf32, #tpu.memory_space<vmem>>, %arg2: memref<2x2x32xf32, #tpu.memory_space<vmem>>, %arg3: memref<4x128xf32, #tpu.memory_space<vmem>>, %arg4: memref<32x128xf32, #tpu.memory_space<vmem>>, %arg5: memref<1x128xf32, #tpu.memory_space<vmem>>, %arg6: memref<32x128xf32, #tpu.memory_space<vmem>>, %arg7: memref<32x128xf32, #tpu.memory_space<vmem>>, %arg8: memref<1x128xf32, #tpu.memory_space<vmem>>, %arg9: memref<32x45xf32, #tpu.memory_space<vmem>>, %arg10: memref<1x45xf32, #tpu.memory_space<vmem>>, %arg11: memref<45x45xf32, #tpu.memory_space<vmem>>, %arg12: memref<1x45xf32, #tpu.memory_space<vmem>>, %arg13: memref<16x45xf32, #tpu.memory_space<vmem>>, %arg14: memref<2x2x32xf32, #tpu.memory_space<vmem>>, %arg15: memref<2x2x32xf32, #tpu.memory_space<vmem>>) attributes {dimension_semantics = [], scalar_prefetch = 0 : i64, scratch_operands = 0 : i64, tpu.core_type = #tpu.core_type<tc>} {
    %c0 = arith.constant 0 : index
    %c0_0 = arith.constant 0 : index
    %0 = vector.load %arg0[%c0, %c0_0] : memref<16x4xf32, #tpu.memory_space<vmem>>, vector<16x4xf32>
    %c0_1 = arith.constant 0 : index
    %c0_2 = arith.constant 0 : index
    %1 = vector.load %arg3[%c0_1, %c0_2] : memref<4x128xf32, #tpu.memory_space<vmem>>, vector<4x128xf32>
    %cst = arith.constant dense<0.000000e+00> : vector<16x128xf32>
    %2 = tpu.matmul %0, %1, %cst {dimension_numbers = #tpu.dot_dimension_numbers<[1], [0], [0], [1], [0, 0, 1, 1], [], []>} : vector<16x4xf32>, vector<4x128xf32>, vector<16x128xf32> -> vector<16x128xf32>
    %c0_3 = arith.constant 0 : index
    %c0_4 = arith.constant 0 : index
    %3 = vector.load %arg5[%c0_3, %c0_4] : memref<1x128xf32, #tpu.memory_space<vmem>>, vector<1x128xf32>
    %4 = vector.broadcast %3 : vector<1x128xf32> to vector<16x128xf32>
    %5 = arith.addf %2, %4 : vector<16x128xf32>
    %c0_5 = arith.constant 0 : index
    %c0_6 = arith.constant 0 : index
    %6 = vector.load %arg4[%c0_5, %c0_6] : memref<32x128xf32, #tpu.memory_space<vmem>>, vector<32x128xf32>
    %c0_7 = arith.constant 0 : index
    %c0_8 = arith.constant 0 : index
    %c0_9 = arith.constant 0 : index
    %7 = vector.load %arg1[%c0_7, %c0_8, %c0_9] : memref<2x2x32xf32, #tpu.memory_space<vmem>>, vector<1x2x32xf32>
    %8 = vector.shape_cast %7 : vector<1x2x32xf32> to vector<2x32xf32>
    %c0_10 = arith.constant 0 : index
    %c0_11 = arith.constant 0 : index
    %c0_12 = arith.constant 0 : index
    %9 = vector.load %arg2[%c0_10, %c0_11, %c0_12] : memref<2x2x32xf32, #tpu.memory_space<vmem>>, vector<1x2x32xf32>
    %10 = vector.shape_cast %9 : vector<1x2x32xf32> to vector<2x32xf32>
    %11 = vector.extract_strided_slice %5 {offsets = [0, 0], sizes = [2, 128], strides = [1, 1]} : vector<16x128xf32> to vector<2x128xf32>
    %cst_13 = arith.constant dense<0.000000e+00> : vector<2x128xf32>
    %12 = tpu.matmul %8, %6, %cst_13 {dimension_numbers = #tpu.dot_dimension_numbers<[1], [0], [0], [1], [0, 0, 1, 1], [], []>} : vector<2x32xf32>, vector<32x128xf32>, vector<2x128xf32> -> vector<2x128xf32>
    %13 = arith.addf %11, %12 : vector<2x128xf32>
    %14 = vector.extract_strided_slice %13 {offsets = [0, 0], sizes = [2, 96], strides = [1, 1]} : vector<2x128xf32> to vector<2x96xf32>
    %15 = arith.negf %14 : vector<2x96xf32>
    %16 = math.exp %15 : vector<2x96xf32>
    %cst_14 = arith.constant 1.000000e+00 : f32
    %17 = vector.broadcast %cst_14 : f32 to vector<2x96xf32>
    %18 = arith.addf %17, %16 : vector<2x96xf32>
    %19 = arith.divf %17, %18 : vector<2x96xf32>
    %20 = vector.extract_strided_slice %13 {offsets = [0, 96], sizes = [2, 32], strides = [1, 1]} : vector<2x128xf32> to vector<2x32xf32>
    %21 = math.tanh %20 : vector<2x32xf32>
    %22 = vector.extract_strided_slice %19 {offsets = [0, 0], sizes = [2, 32], strides = [1, 1]} : vector<2x96xf32> to vector<2x32xf32>
    %23 = vector.extract_strided_slice %19 {offsets = [0, 32], sizes = [2, 32], strides = [1, 1]} : vector<2x96xf32> to vector<2x32xf32>
    %24 = vector.extract_strided_slice %19 {offsets = [0, 64], sizes = [2, 32], strides = [1, 1]} : vector<2x96xf32> to vector<2x32xf32>
    %25 = arith.mulf %23, %10 : vector<2x32xf32>
    %26 = arith.mulf %22, %21 : vector<2x32xf32>
    %27 = arith.addf %25, %26 : vector<2x32xf32>
    %28 = math.tanh %27 : vector<2x32xf32>
    %29 = arith.mulf %24, %28 : vector<2x32xf32>
    %30 = vector.extract_strided_slice %5 {offsets = [2, 0], sizes = [2, 128], strides = [1, 1]} : vector<16x128xf32> to vector<2x128xf32>
    %cst_15 = arith.constant dense<0.000000e+00> : vector<2x128xf32>
    %31 = tpu.matmul %29, %6, %cst_15 {dimension_numbers = #tpu.dot_dimension_numbers<[1], [0], [0], [1], [0, 0, 1, 1], [], []>} : vector<2x32xf32>, vector<32x128xf32>, vector<2x128xf32> -> vector<2x128xf32>
    %32 = arith.addf %30, %31 : vector<2x128xf32>
    %33 = vector.extract_strided_slice %32 {offsets = [0, 0], sizes = [2, 96], strides = [1, 1]} : vector<2x128xf32> to vector<2x96xf32>
    %34 = arith.negf %33 : vector<2x96xf32>
    %35 = math.exp %34 : vector<2x96xf32>
    %cst_16 = arith.constant 1.000000e+00 : f32
    %36 = vector.broadcast %cst_16 : f32 to vector<2x96xf32>
    %37 = arith.addf %36, %35 : vector<2x96xf32>
    %38 = arith.divf %36, %37 : vector<2x96xf32>
    %39 = vector.extract_strided_slice %32 {offsets = [0, 96], sizes = [2, 32], strides = [1, 1]} : vector<2x128xf32> to vector<2x32xf32>
    %40 = math.tanh %39 : vector<2x32xf32>
    %41 = vector.extract_strided_slice %38 {offsets = [0, 0], sizes = [2, 32], strides = [1, 1]} : vector<2x96xf32> to vector<2x32xf32>
    %42 = vector.extract_strided_slice %38 {offsets = [0, 32], sizes = [2, 32], strides = [1, 1]} : vector<2x96xf32> to vector<2x32xf32>
    %43 = vector.extract_strided_slice %38 {offsets = [0, 64], sizes = [2, 32], strides = [1, 1]} : vector<2x96xf32> to vector<2x32xf32>
    %44 = arith.mulf %42, %27 : vector<2x32xf32>
    %45 = arith.mulf %41, %40 : vector<2x32xf32>
    %46 = arith.addf %44, %45 : vector<2x32xf32>
    %47 = math.tanh %46 : vector<2x32xf32>
    %48 = arith.mulf %43, %47 : vector<2x32xf32>
    %49 = vector.extract_strided_slice %5 {offsets = [4, 0], sizes = [2, 128], strides = [1, 1]} : vector<16x128xf32> to vector<2x128xf32>
    %cst_17 = arith.constant dense<0.000000e+00> : vector<2x128xf32>
    %50 = tpu.matmul %48, %6, %cst_17 {dimension_numbers = #tpu.dot_dimension_numbers<[1], [0], [0], [1], [0, 0, 1, 1], [], []>} : vector<2x32xf32>, vector<32x128xf32>, vector<2x128xf32> -> vector<2x128xf32>
    %51 = arith.addf %49, %50 : vector<2x128xf32>
    %52 = vector.extract_strided_slice %51 {offsets = [0, 0], sizes = [2, 96], strides = [1, 1]} : vector<2x128xf32> to vector<2x96xf32>
    %53 = arith.negf %52 : vector<2x96xf32>
    %54 = math.exp %53 : vector<2x96xf32>
    %cst_18 = arith.constant 1.000000e+00 : f32
    %55 = vector.broadcast %cst_18 : f32 to vector<2x96xf32>
    %56 = arith.addf %55, %54 : vector<2x96xf32>
    %57 = arith.divf %55, %56 : vector<2x96xf32>
    %58 = vector.extract_strided_slice %51 {offsets = [0, 96], sizes = [2, 32], strides = [1, 1]} : vector<2x128xf32> to vector<2x32xf32>
    %59 = math.tanh %58 : vector<2x32xf32>
    %60 = vector.extract_strided_slice %57 {offsets = [0, 0], sizes = [2, 32], strides = [1, 1]} : vector<2x96xf32> to vector<2x32xf32>
    %61 = vector.extract_strided_slice %57 {offsets = [0, 32], sizes = [2, 32], strides = [1, 1]} : vector<2x96xf32> to vector<2x32xf32>
    %62 = vector.extract_strided_slice %57 {offsets = [0, 64], sizes = [2, 32], strides = [1, 1]} : vector<2x96xf32> to vector<2x32xf32>
    %63 = arith.mulf %61, %46 : vector<2x32xf32>
    %64 = arith.mulf %60, %59 : vector<2x32xf32>
    %65 = arith.addf %63, %64 : vector<2x32xf32>
    %66 = math.tanh %65 : vector<2x32xf32>
    %67 = arith.mulf %62, %66 : vector<2x32xf32>
    %68 = vector.extract_strided_slice %5 {offsets = [6, 0], sizes = [2, 128], strides = [1, 1]} : vector<16x128xf32> to vector<2x128xf32>
    %cst_19 = arith.constant dense<0.000000e+00> : vector<2x128xf32>
    %69 = tpu.matmul %67, %6, %cst_19 {dimension_numbers = #tpu.dot_dimension_numbers<[1], [0], [0], [1], [0, 0, 1, 1], [], []>} : vector<2x32xf32>, vector<32x128xf32>, vector<2x128xf32> -> vector<2x128xf32>
    %70 = arith.addf %68, %69 : vector<2x128xf32>
    %71 = vector.extract_strided_slice %70 {offsets = [0, 0], sizes = [2, 96], strides = [1, 1]} : vector<2x128xf32> to vector<2x96xf32>
    %72 = arith.negf %71 : vector<2x96xf32>
    %73 = math.exp %72 : vector<2x96xf32>
    %cst_20 = arith.constant 1.000000e+00 : f32
    %74 = vector.broadcast %cst_20 : f32 to vector<2x96xf32>
    %75 = arith.addf %74, %73 : vector<2x96xf32>
    %76 = arith.divf %74, %75 : vector<2x96xf32>
    %77 = vector.extract_strided_slice %70 {offsets = [0, 96], sizes = [2, 32], strides = [1, 1]} : vector<2x128xf32> to vector<2x32xf32>
    %78 = math.tanh %77 : vector<2x32xf32>
    %79 = vector.extract_strided_slice %76 {offsets = [0, 0], sizes = [2, 32], strides = [1, 1]} : vector<2x96xf32> to vector<2x32xf32>
    %80 = vector.extract_strided_slice %76 {offsets = [0, 32], sizes = [2, 32], strides = [1, 1]} : vector<2x96xf32> to vector<2x32xf32>
    %81 = vector.extract_strided_slice %76 {offsets = [0, 64], sizes = [2, 32], strides = [1, 1]} : vector<2x96xf32> to vector<2x32xf32>
    %82 = arith.mulf %80, %65 : vector<2x32xf32>
    %83 = arith.mulf %79, %78 : vector<2x32xf32>
    %84 = arith.addf %82, %83 : vector<2x32xf32>
    %85 = math.tanh %84 : vector<2x32xf32>
    %86 = arith.mulf %81, %85 : vector<2x32xf32>
    %87 = vector.extract_strided_slice %5 {offsets = [8, 0], sizes = [2, 128], strides = [1, 1]} : vector<16x128xf32> to vector<2x128xf32>
    %cst_21 = arith.constant dense<0.000000e+00> : vector<2x128xf32>
    %88 = tpu.matmul %86, %6, %cst_21 {dimension_numbers = #tpu.dot_dimension_numbers<[1], [0], [0], [1], [0, 0, 1, 1], [], []>} : vector<2x32xf32>, vector<32x128xf32>, vector<2x128xf32> -> vector<2x128xf32>
    %89 = arith.addf %87, %88 : vector<2x128xf32>
    %90 = vector.extract_strided_slice %89 {offsets = [0, 0], sizes = [2, 96], strides = [1, 1]} : vector<2x128xf32> to vector<2x96xf32>
    %91 = arith.negf %90 : vector<2x96xf32>
    %92 = math.exp %91 : vector<2x96xf32>
    %cst_22 = arith.constant 1.000000e+00 : f32
    %93 = vector.broadcast %cst_22 : f32 to vector<2x96xf32>
    %94 = arith.addf %93, %92 : vector<2x96xf32>
    %95 = arith.divf %93, %94 : vector<2x96xf32>
    %96 = vector.extract_strided_slice %89 {offsets = [0, 96], sizes = [2, 32], strides = [1, 1]} : vector<2x128xf32> to vector<2x32xf32>
    %97 = math.tanh %96 : vector<2x32xf32>
    %98 = vector.extract_strided_slice %95 {offsets = [0, 0], sizes = [2, 32], strides = [1, 1]} : vector<2x96xf32> to vector<2x32xf32>
    %99 = vector.extract_strided_slice %95 {offsets = [0, 32], sizes = [2, 32], strides = [1, 1]} : vector<2x96xf32> to vector<2x32xf32>
    %100 = vector.extract_strided_slice %95 {offsets = [0, 64], sizes = [2, 32], strides = [1, 1]} : vector<2x96xf32> to vector<2x32xf32>
    %101 = arith.mulf %99, %84 : vector<2x32xf32>
    %102 = arith.mulf %98, %97 : vector<2x32xf32>
    %103 = arith.addf %101, %102 : vector<2x32xf32>
    %104 = math.tanh %103 : vector<2x32xf32>
    %105 = arith.mulf %100, %104 : vector<2x32xf32>
    %106 = vector.extract_strided_slice %5 {offsets = [10, 0], sizes = [2, 128], strides = [1, 1]} : vector<16x128xf32> to vector<2x128xf32>
    %cst_23 = arith.constant dense<0.000000e+00> : vector<2x128xf32>
    %107 = tpu.matmul %105, %6, %cst_23 {dimension_numbers = #tpu.dot_dimension_numbers<[1], [0], [0], [1], [0, 0, 1, 1], [], []>} : vector<2x32xf32>, vector<32x128xf32>, vector<2x128xf32> -> vector<2x128xf32>
    %108 = arith.addf %106, %107 : vector<2x128xf32>
    %109 = vector.extract_strided_slice %108 {offsets = [0, 0], sizes = [2, 96], strides = [1, 1]} : vector<2x128xf32> to vector<2x96xf32>
    %110 = arith.negf %109 : vector<2x96xf32>
    %111 = math.exp %110 : vector<2x96xf32>
    %cst_24 = arith.constant 1.000000e+00 : f32
    %112 = vector.broadcast %cst_24 : f32 to vector<2x96xf32>
    %113 = arith.addf %112, %111 : vector<2x96xf32>
    %114 = arith.divf %112, %113 : vector<2x96xf32>
    %115 = vector.extract_strided_slice %108 {offsets = [0, 96], sizes = [2, 32], strides = [1, 1]} : vector<2x128xf32> to vector<2x32xf32>
    %116 = math.tanh %115 : vector<2x32xf32>
    %117 = vector.extract_strided_slice %114 {offsets = [0, 0], sizes = [2, 32], strides = [1, 1]} : vector<2x96xf32> to vector<2x32xf32>
    %118 = vector.extract_strided_slice %114 {offsets = [0, 32], sizes = [2, 32], strides = [1, 1]} : vector<2x96xf32> to vector<2x32xf32>
    %119 = vector.extract_strided_slice %114 {offsets = [0, 64], sizes = [2, 32], strides = [1, 1]} : vector<2x96xf32> to vector<2x32xf32>
    %120 = arith.mulf %118, %103 : vector<2x32xf32>
    %121 = arith.mulf %117, %116 : vector<2x32xf32>
    %122 = arith.addf %120, %121 : vector<2x32xf32>
    %123 = math.tanh %122 : vector<2x32xf32>
    %124 = arith.mulf %119, %123 : vector<2x32xf32>
    %125 = vector.extract_strided_slice %5 {offsets = [12, 0], sizes = [2, 128], strides = [1, 1]} : vector<16x128xf32> to vector<2x128xf32>
    %cst_25 = arith.constant dense<0.000000e+00> : vector<2x128xf32>
    %126 = tpu.matmul %124, %6, %cst_25 {dimension_numbers = #tpu.dot_dimension_numbers<[1], [0], [0], [1], [0, 0, 1, 1], [], []>} : vector<2x32xf32>, vector<32x128xf32>, vector<2x128xf32> -> vector<2x128xf32>
    %127 = arith.addf %125, %126 : vector<2x128xf32>
    %128 = vector.extract_strided_slice %127 {offsets = [0, 0], sizes = [2, 96], strides = [1, 1]} : vector<2x128xf32> to vector<2x96xf32>
    %129 = arith.negf %128 : vector<2x96xf32>
    %130 = math.exp %129 : vector<2x96xf32>
    %cst_26 = arith.constant 1.000000e+00 : f32
    %131 = vector.broadcast %cst_26 : f32 to vector<2x96xf32>
    %132 = arith.addf %131, %130 : vector<2x96xf32>
    %133 = arith.divf %131, %132 : vector<2x96xf32>
    %134 = vector.extract_strided_slice %127 {offsets = [0, 96], sizes = [2, 32], strides = [1, 1]} : vector<2x128xf32> to vector<2x32xf32>
    %135 = math.tanh %134 : vector<2x32xf32>
    %136 = vector.extract_strided_slice %133 {offsets = [0, 0], sizes = [2, 32], strides = [1, 1]} : vector<2x96xf32> to vector<2x32xf32>
    %137 = vector.extract_strided_slice %133 {offsets = [0, 32], sizes = [2, 32], strides = [1, 1]} : vector<2x96xf32> to vector<2x32xf32>
    %138 = vector.extract_strided_slice %133 {offsets = [0, 64], sizes = [2, 32], strides = [1, 1]} : vector<2x96xf32> to vector<2x32xf32>
    %139 = arith.mulf %137, %122 : vector<2x32xf32>
    %140 = arith.mulf %136, %135 : vector<2x32xf32>
    %141 = arith.addf %139, %140 : vector<2x32xf32>
    %142 = math.tanh %141 : vector<2x32xf32>
    %143 = arith.mulf %138, %142 : vector<2x32xf32>
    %144 = vector.extract_strided_slice %5 {offsets = [14, 0], sizes = [2, 128], strides = [1, 1]} : vector<16x128xf32> to vector<2x128xf32>
    %cst_27 = arith.constant dense<0.000000e+00> : vector<2x128xf32>
    %145 = tpu.matmul %143, %6, %cst_27 {dimension_numbers = #tpu.dot_dimension_numbers<[1], [0], [0], [1], [0, 0, 1, 1], [], []>} : vector<2x32xf32>, vector<32x128xf32>, vector<2x128xf32> -> vector<2x128xf32>
    %146 = arith.addf %144, %145 : vector<2x128xf32>
    %147 = vector.extract_strided_slice %146 {offsets = [0, 0], sizes = [2, 96], strides = [1, 1]} : vector<2x128xf32> to vector<2x96xf32>
    %148 = arith.negf %147 : vector<2x96xf32>
    %149 = math.exp %148 : vector<2x96xf32>
    %cst_28 = arith.constant 1.000000e+00 : f32
    %150 = vector.broadcast %cst_28 : f32 to vector<2x96xf32>
    %151 = arith.addf %150, %149 : vector<2x96xf32>
    %152 = arith.divf %150, %151 : vector<2x96xf32>
    %153 = vector.extract_strided_slice %146 {offsets = [0, 96], sizes = [2, 32], strides = [1, 1]} : vector<2x128xf32> to vector<2x32xf32>
    %154 = math.tanh %153 : vector<2x32xf32>
    %155 = vector.extract_strided_slice %152 {offsets = [0, 0], sizes = [2, 32], strides = [1, 1]} : vector<2x96xf32> to vector<2x32xf32>
    %156 = vector.extract_strided_slice %152 {offsets = [0, 32], sizes = [2, 32], strides = [1, 1]} : vector<2x96xf32> to vector<2x32xf32>
    %157 = vector.extract_strided_slice %152 {offsets = [0, 64], sizes = [2, 32], strides = [1, 1]} : vector<2x96xf32> to vector<2x32xf32>
    %158 = arith.mulf %156, %141 : vector<2x32xf32>
    %159 = arith.mulf %155, %154 : vector<2x32xf32>
    %160 = arith.addf %158, %159 : vector<2x32xf32>
    %161 = math.tanh %160 : vector<2x32xf32>
    %162 = arith.mulf %157, %161 : vector<2x32xf32>
    %163 = tpu.concatenate %29, %48, %67, %86, %105, %124, %143, %162 in 0 : vector<2x32xf32>, vector<2x32xf32>, vector<2x32xf32>, vector<2x32xf32>, vector<2x32xf32>, vector<2x32xf32>, vector<2x32xf32>, vector<2x32xf32> -> vector<16x32xf32>
    %c0_29 = arith.constant 0 : index
    %c0_30 = arith.constant 0 : index
    %164 = vector.load %arg6[%c0_29, %c0_30] : memref<32x128xf32, #tpu.memory_space<vmem>>, vector<32x128xf32>
    %cst_31 = arith.constant dense<0.000000e+00> : vector<16x128xf32>
    %165 = tpu.matmul %163, %164, %cst_31 {dimension_numbers = #tpu.dot_dimension_numbers<[1], [0], [0], [1], [0, 0, 1, 1], [], []>} : vector<16x32xf32>, vector<32x128xf32>, vector<16x128xf32> -> vector<16x128xf32>
    %c0_32 = arith.constant 0 : index
    %c0_33 = arith.constant 0 : index
    %166 = vector.load %arg8[%c0_32, %c0_33] : memref<1x128xf32, #tpu.memory_space<vmem>>, vector<1x128xf32>
    %167 = vector.broadcast %166 : vector<1x128xf32> to vector<16x128xf32>
    %168 = arith.addf %165, %167 : vector<16x128xf32>
    %c0_34 = arith.constant 0 : index
    %c0_35 = arith.constant 0 : index
    %169 = vector.load %arg7[%c0_34, %c0_35] : memref<32x128xf32, #tpu.memory_space<vmem>>, vector<32x128xf32>
    %c1 = arith.constant 1 : index
    %c0_36 = arith.constant 0 : index
    %c0_37 = arith.constant 0 : index
    %170 = vector.load %arg1[%c1, %c0_36, %c0_37] : memref<2x2x32xf32, #tpu.memory_space<vmem>>, vector<1x2x32xf32>
    %171 = vector.shape_cast %170 : vector<1x2x32xf32> to vector<2x32xf32>
    %c1_38 = arith.constant 1 : index
    %c0_39 = arith.constant 0 : index
    %c0_40 = arith.constant 0 : index
    %172 = vector.load %arg2[%c1_38, %c0_39, %c0_40] : memref<2x2x32xf32, #tpu.memory_space<vmem>>, vector<1x2x32xf32>
    %173 = vector.shape_cast %172 : vector<1x2x32xf32> to vector<2x32xf32>
    %174 = vector.extract_strided_slice %168 {offsets = [0, 0], sizes = [2, 128], strides = [1, 1]} : vector<16x128xf32> to vector<2x128xf32>
    %cst_41 = arith.constant dense<0.000000e+00> : vector<2x128xf32>
    %175 = tpu.matmul %171, %169, %cst_41 {dimension_numbers = #tpu.dot_dimension_numbers<[1], [0], [0], [1], [0, 0, 1, 1], [], []>} : vector<2x32xf32>, vector<32x128xf32>, vector<2x128xf32> -> vector<2x128xf32>
    %176 = arith.addf %174, %175 : vector<2x128xf32>
    %177 = vector.extract_strided_slice %176 {offsets = [0, 0], sizes = [2, 96], strides = [1, 1]} : vector<2x128xf32> to vector<2x96xf32>
    %178 = arith.negf %177 : vector<2x96xf32>
    %179 = math.exp %178 : vector<2x96xf32>
    %cst_42 = arith.constant 1.000000e+00 : f32
    %180 = vector.broadcast %cst_42 : f32 to vector<2x96xf32>
    %181 = arith.addf %180, %179 : vector<2x96xf32>
    %182 = arith.divf %180, %181 : vector<2x96xf32>
    %183 = vector.extract_strided_slice %176 {offsets = [0, 96], sizes = [2, 32], strides = [1, 1]} : vector<2x128xf32> to vector<2x32xf32>
    %184 = math.tanh %183 : vector<2x32xf32>
    %185 = vector.extract_strided_slice %182 {offsets = [0, 0], sizes = [2, 32], strides = [1, 1]} : vector<2x96xf32> to vector<2x32xf32>
    %186 = vector.extract_strided_slice %182 {offsets = [0, 32], sizes = [2, 32], strides = [1, 1]} : vector<2x96xf32> to vector<2x32xf32>
    %187 = vector.extract_strided_slice %182 {offsets = [0, 64], sizes = [2, 32], strides = [1, 1]} : vector<2x96xf32> to vector<2x32xf32>
    %188 = arith.mulf %186, %173 : vector<2x32xf32>
    %189 = arith.mulf %185, %184 : vector<2x32xf32>
    %190 = arith.addf %188, %189 : vector<2x32xf32>
    %191 = math.tanh %190 : vector<2x32xf32>
    %192 = arith.mulf %187, %191 : vector<2x32xf32>
    %193 = vector.extract_strided_slice %168 {offsets = [2, 0], sizes = [2, 128], strides = [1, 1]} : vector<16x128xf32> to vector<2x128xf32>
    %cst_43 = arith.constant dense<0.000000e+00> : vector<2x128xf32>
    %194 = tpu.matmul %192, %169, %cst_43 {dimension_numbers = #tpu.dot_dimension_numbers<[1], [0], [0], [1], [0, 0, 1, 1], [], []>} : vector<2x32xf32>, vector<32x128xf32>, vector<2x128xf32> -> vector<2x128xf32>
    %195 = arith.addf %193, %194 : vector<2x128xf32>
    %196 = vector.extract_strided_slice %195 {offsets = [0, 0], sizes = [2, 96], strides = [1, 1]} : vector<2x128xf32> to vector<2x96xf32>
    %197 = arith.negf %196 : vector<2x96xf32>
    %198 = math.exp %197 : vector<2x96xf32>
    %cst_44 = arith.constant 1.000000e+00 : f32
    %199 = vector.broadcast %cst_44 : f32 to vector<2x96xf32>
    %200 = arith.addf %199, %198 : vector<2x96xf32>
    %201 = arith.divf %199, %200 : vector<2x96xf32>
    %202 = vector.extract_strided_slice %195 {offsets = [0, 96], sizes = [2, 32], strides = [1, 1]} : vector<2x128xf32> to vector<2x32xf32>
    %203 = math.tanh %202 : vector<2x32xf32>
    %204 = vector.extract_strided_slice %201 {offsets = [0, 0], sizes = [2, 32], strides = [1, 1]} : vector<2x96xf32> to vector<2x32xf32>
    %205 = vector.extract_strided_slice %201 {offsets = [0, 32], sizes = [2, 32], strides = [1, 1]} : vector<2x96xf32> to vector<2x32xf32>
    %206 = vector.extract_strided_slice %201 {offsets = [0, 64], sizes = [2, 32], strides = [1, 1]} : vector<2x96xf32> to vector<2x32xf32>
    %207 = arith.mulf %205, %190 : vector<2x32xf32>
    %208 = arith.mulf %204, %203 : vector<2x32xf32>
    %209 = arith.addf %207, %208 : vector<2x32xf32>
    %210 = math.tanh %209 : vector<2x32xf32>
    %211 = arith.mulf %206, %210 : vector<2x32xf32>
    %212 = vector.extract_strided_slice %168 {offsets = [4, 0], sizes = [2, 128], strides = [1, 1]} : vector<16x128xf32> to vector<2x128xf32>
    %cst_45 = arith.constant dense<0.000000e+00> : vector<2x128xf32>
    %213 = tpu.matmul %211, %169, %cst_45 {dimension_numbers = #tpu.dot_dimension_numbers<[1], [0], [0], [1], [0, 0, 1, 1], [], []>} : vector<2x32xf32>, vector<32x128xf32>, vector<2x128xf32> -> vector<2x128xf32>
    %214 = arith.addf %212, %213 : vector<2x128xf32>
    %215 = vector.extract_strided_slice %214 {offsets = [0, 0], sizes = [2, 96], strides = [1, 1]} : vector<2x128xf32> to vector<2x96xf32>
    %216 = arith.negf %215 : vector<2x96xf32>
    %217 = math.exp %216 : vector<2x96xf32>
    %cst_46 = arith.constant 1.000000e+00 : f32
    %218 = vector.broadcast %cst_46 : f32 to vector<2x96xf32>
    %219 = arith.addf %218, %217 : vector<2x96xf32>
    %220 = arith.divf %218, %219 : vector<2x96xf32>
    %221 = vector.extract_strided_slice %214 {offsets = [0, 96], sizes = [2, 32], strides = [1, 1]} : vector<2x128xf32> to vector<2x32xf32>
    %222 = math.tanh %221 : vector<2x32xf32>
    %223 = vector.extract_strided_slice %220 {offsets = [0, 0], sizes = [2, 32], strides = [1, 1]} : vector<2x96xf32> to vector<2x32xf32>
    %224 = vector.extract_strided_slice %220 {offsets = [0, 32], sizes = [2, 32], strides = [1, 1]} : vector<2x96xf32> to vector<2x32xf32>
    %225 = vector.extract_strided_slice %220 {offsets = [0, 64], sizes = [2, 32], strides = [1, 1]} : vector<2x96xf32> to vector<2x32xf32>
    %226 = arith.mulf %224, %209 : vector<2x32xf32>
    %227 = arith.mulf %223, %222 : vector<2x32xf32>
    %228 = arith.addf %226, %227 : vector<2x32xf32>
    %229 = math.tanh %228 : vector<2x32xf32>
    %230 = arith.mulf %225, %229 : vector<2x32xf32>
    %231 = vector.extract_strided_slice %168 {offsets = [6, 0], sizes = [2, 128], strides = [1, 1]} : vector<16x128xf32> to vector<2x128xf32>
    %cst_47 = arith.constant dense<0.000000e+00> : vector<2x128xf32>
    %232 = tpu.matmul %230, %169, %cst_47 {dimension_numbers = #tpu.dot_dimension_numbers<[1], [0], [0], [1], [0, 0, 1, 1], [], []>} : vector<2x32xf32>, vector<32x128xf32>, vector<2x128xf32> -> vector<2x128xf32>
    %233 = arith.addf %231, %232 : vector<2x128xf32>
    %234 = vector.extract_strided_slice %233 {offsets = [0, 0], sizes = [2, 96], strides = [1, 1]} : vector<2x128xf32> to vector<2x96xf32>
    %235 = arith.negf %234 : vector<2x96xf32>
    %236 = math.exp %235 : vector<2x96xf32>
    %cst_48 = arith.constant 1.000000e+00 : f32
    %237 = vector.broadcast %cst_48 : f32 to vector<2x96xf32>
    %238 = arith.addf %237, %236 : vector<2x96xf32>
    %239 = arith.divf %237, %238 : vector<2x96xf32>
    %240 = vector.extract_strided_slice %233 {offsets = [0, 96], sizes = [2, 32], strides = [1, 1]} : vector<2x128xf32> to vector<2x32xf32>
    %241 = math.tanh %240 : vector<2x32xf32>
    %242 = vector.extract_strided_slice %239 {offsets = [0, 0], sizes = [2, 32], strides = [1, 1]} : vector<2x96xf32> to vector<2x32xf32>
    %243 = vector.extract_strided_slice %239 {offsets = [0, 32], sizes = [2, 32], strides = [1, 1]} : vector<2x96xf32> to vector<2x32xf32>
    %244 = vector.extract_strided_slice %239 {offsets = [0, 64], sizes = [2, 32], strides = [1, 1]} : vector<2x96xf32> to vector<2x32xf32>
    %245 = arith.mulf %243, %228 : vector<2x32xf32>
    %246 = arith.mulf %242, %241 : vector<2x32xf32>
    %247 = arith.addf %245, %246 : vector<2x32xf32>
    %248 = math.tanh %247 : vector<2x32xf32>
    %249 = arith.mulf %244, %248 : vector<2x32xf32>
    %250 = vector.extract_strided_slice %168 {offsets = [8, 0], sizes = [2, 128], strides = [1, 1]} : vector<16x128xf32> to vector<2x128xf32>
    %cst_49 = arith.constant dense<0.000000e+00> : vector<2x128xf32>
    %251 = tpu.matmul %249, %169, %cst_49 {dimension_numbers = #tpu.dot_dimension_numbers<[1], [0], [0], [1], [0, 0, 1, 1], [], []>} : vector<2x32xf32>, vector<32x128xf32>, vector<2x128xf32> -> vector<2x128xf32>
    %252 = arith.addf %250, %251 : vector<2x128xf32>
    %253 = vector.extract_strided_slice %252 {offsets = [0, 0], sizes = [2, 96], strides = [1, 1]} : vector<2x128xf32> to vector<2x96xf32>
    %254 = arith.negf %253 : vector<2x96xf32>
    %255 = math.exp %254 : vector<2x96xf32>
    %cst_50 = arith.constant 1.000000e+00 : f32
    %256 = vector.broadcast %cst_50 : f32 to vector<2x96xf32>
    %257 = arith.addf %256, %255 : vector<2x96xf32>
    %258 = arith.divf %256, %257 : vector<2x96xf32>
    %259 = vector.extract_strided_slice %252 {offsets = [0, 96], sizes = [2, 32], strides = [1, 1]} : vector<2x128xf32> to vector<2x32xf32>
    %260 = math.tanh %259 : vector<2x32xf32>
    %261 = vector.extract_strided_slice %258 {offsets = [0, 0], sizes = [2, 32], strides = [1, 1]} : vector<2x96xf32> to vector<2x32xf32>
    %262 = vector.extract_strided_slice %258 {offsets = [0, 32], sizes = [2, 32], strides = [1, 1]} : vector<2x96xf32> to vector<2x32xf32>
    %263 = vector.extract_strided_slice %258 {offsets = [0, 64], sizes = [2, 32], strides = [1, 1]} : vector<2x96xf32> to vector<2x32xf32>
    %264 = arith.mulf %262, %247 : vector<2x32xf32>
    %265 = arith.mulf %261, %260 : vector<2x32xf32>
    %266 = arith.addf %264, %265 : vector<2x32xf32>
    %267 = math.tanh %266 : vector<2x32xf32>
    %268 = arith.mulf %263, %267 : vector<2x32xf32>
    %269 = vector.extract_strided_slice %168 {offsets = [10, 0], sizes = [2, 128], strides = [1, 1]} : vector<16x128xf32> to vector<2x128xf32>
    %cst_51 = arith.constant dense<0.000000e+00> : vector<2x128xf32>
    %270 = tpu.matmul %268, %169, %cst_51 {dimension_numbers = #tpu.dot_dimension_numbers<[1], [0], [0], [1], [0, 0, 1, 1], [], []>} : vector<2x32xf32>, vector<32x128xf32>, vector<2x128xf32> -> vector<2x128xf32>
    %271 = arith.addf %269, %270 : vector<2x128xf32>
    %272 = vector.extract_strided_slice %271 {offsets = [0, 0], sizes = [2, 96], strides = [1, 1]} : vector<2x128xf32> to vector<2x96xf32>
    %273 = arith.negf %272 : vector<2x96xf32>
    %274 = math.exp %273 : vector<2x96xf32>
    %cst_52 = arith.constant 1.000000e+00 : f32
    %275 = vector.broadcast %cst_52 : f32 to vector<2x96xf32>
    %276 = arith.addf %275, %274 : vector<2x96xf32>
    %277 = arith.divf %275, %276 : vector<2x96xf32>
    %278 = vector.extract_strided_slice %271 {offsets = [0, 96], sizes = [2, 32], strides = [1, 1]} : vector<2x128xf32> to vector<2x32xf32>
    %279 = math.tanh %278 : vector<2x32xf32>
    %280 = vector.extract_strided_slice %277 {offsets = [0, 0], sizes = [2, 32], strides = [1, 1]} : vector<2x96xf32> to vector<2x32xf32>
    %281 = vector.extract_strided_slice %277 {offsets = [0, 32], sizes = [2, 32], strides = [1, 1]} : vector<2x96xf32> to vector<2x32xf32>
    %282 = vector.extract_strided_slice %277 {offsets = [0, 64], sizes = [2, 32], strides = [1, 1]} : vector<2x96xf32> to vector<2x32xf32>
    %283 = arith.mulf %281, %266 : vector<2x32xf32>
    %284 = arith.mulf %280, %279 : vector<2x32xf32>
    %285 = arith.addf %283, %284 : vector<2x32xf32>
    %286 = math.tanh %285 : vector<2x32xf32>
    %287 = arith.mulf %282, %286 : vector<2x32xf32>
    %288 = vector.extract_strided_slice %168 {offsets = [12, 0], sizes = [2, 128], strides = [1, 1]} : vector<16x128xf32> to vector<2x128xf32>
    %cst_53 = arith.constant dense<0.000000e+00> : vector<2x128xf32>
    %289 = tpu.matmul %287, %169, %cst_53 {dimension_numbers = #tpu.dot_dimension_numbers<[1], [0], [0], [1], [0, 0, 1, 1], [], []>} : vector<2x32xf32>, vector<32x128xf32>, vector<2x128xf32> -> vector<2x128xf32>
    %290 = arith.addf %288, %289 : vector<2x128xf32>
    %291 = vector.extract_strided_slice %290 {offsets = [0, 0], sizes = [2, 96], strides = [1, 1]} : vector<2x128xf32> to vector<2x96xf32>
    %292 = arith.negf %291 : vector<2x96xf32>
    %293 = math.exp %292 : vector<2x96xf32>
    %cst_54 = arith.constant 1.000000e+00 : f32
    %294 = vector.broadcast %cst_54 : f32 to vector<2x96xf32>
    %295 = arith.addf %294, %293 : vector<2x96xf32>
    %296 = arith.divf %294, %295 : vector<2x96xf32>
    %297 = vector.extract_strided_slice %290 {offsets = [0, 96], sizes = [2, 32], strides = [1, 1]} : vector<2x128xf32> to vector<2x32xf32>
    %298 = math.tanh %297 : vector<2x32xf32>
    %299 = vector.extract_strided_slice %296 {offsets = [0, 0], sizes = [2, 32], strides = [1, 1]} : vector<2x96xf32> to vector<2x32xf32>
    %300 = vector.extract_strided_slice %296 {offsets = [0, 32], sizes = [2, 32], strides = [1, 1]} : vector<2x96xf32> to vector<2x32xf32>
    %301 = vector.extract_strided_slice %296 {offsets = [0, 64], sizes = [2, 32], strides = [1, 1]} : vector<2x96xf32> to vector<2x32xf32>
    %302 = arith.mulf %300, %285 : vector<2x32xf32>
    %303 = arith.mulf %299, %298 : vector<2x32xf32>
    %304 = arith.addf %302, %303 : vector<2x32xf32>
    %305 = math.tanh %304 : vector<2x32xf32>
    %306 = arith.mulf %301, %305 : vector<2x32xf32>
    %307 = vector.extract_strided_slice %168 {offsets = [14, 0], sizes = [2, 128], strides = [1, 1]} : vector<16x128xf32> to vector<2x128xf32>
    %cst_55 = arith.constant dense<0.000000e+00> : vector<2x128xf32>
    %308 = tpu.matmul %306, %169, %cst_55 {dimension_numbers = #tpu.dot_dimension_numbers<[1], [0], [0], [1], [0, 0, 1, 1], [], []>} : vector<2x32xf32>, vector<32x128xf32>, vector<2x128xf32> -> vector<2x128xf32>
    %309 = arith.addf %307, %308 : vector<2x128xf32>
    %310 = vector.extract_strided_slice %309 {offsets = [0, 0], sizes = [2, 96], strides = [1, 1]} : vector<2x128xf32> to vector<2x96xf32>
    %311 = arith.negf %310 : vector<2x96xf32>
    %312 = math.exp %311 : vector<2x96xf32>
    %cst_56 = arith.constant 1.000000e+00 : f32
    %313 = vector.broadcast %cst_56 : f32 to vector<2x96xf32>
    %314 = arith.addf %313, %312 : vector<2x96xf32>
    %315 = arith.divf %313, %314 : vector<2x96xf32>
    %316 = vector.extract_strided_slice %309 {offsets = [0, 96], sizes = [2, 32], strides = [1, 1]} : vector<2x128xf32> to vector<2x32xf32>
    %317 = math.tanh %316 : vector<2x32xf32>
    %318 = vector.extract_strided_slice %315 {offsets = [0, 0], sizes = [2, 32], strides = [1, 1]} : vector<2x96xf32> to vector<2x32xf32>
    %319 = vector.extract_strided_slice %315 {offsets = [0, 32], sizes = [2, 32], strides = [1, 1]} : vector<2x96xf32> to vector<2x32xf32>
    %320 = vector.extract_strided_slice %315 {offsets = [0, 64], sizes = [2, 32], strides = [1, 1]} : vector<2x96xf32> to vector<2x32xf32>
    %321 = arith.mulf %319, %304 : vector<2x32xf32>
    %322 = arith.mulf %318, %317 : vector<2x32xf32>
    %323 = arith.addf %321, %322 : vector<2x32xf32>
    %324 = math.tanh %323 : vector<2x32xf32>
    %325 = arith.mulf %320, %324 : vector<2x32xf32>
    %326 = tpu.concatenate %192, %211, %230, %249, %268, %287, %306, %325 in 0 : vector<2x32xf32>, vector<2x32xf32>, vector<2x32xf32>, vector<2x32xf32>, vector<2x32xf32>, vector<2x32xf32>, vector<2x32xf32>, vector<2x32xf32> -> vector<16x32xf32>
    %327 = vector.shape_cast %162 : vector<2x32xf32> to vector<1x2x32xf32>
    %328 = vector.shape_cast %325 : vector<2x32xf32> to vector<1x2x32xf32>
    %329 = tpu.concatenate %327, %328 in 0 : vector<1x2x32xf32>, vector<1x2x32xf32> -> vector<2x2x32xf32>
    %c0_57 = arith.constant 0 : index
    %c0_58 = arith.constant 0 : index
    %c0_59 = arith.constant 0 : index
    %330 = vector.load %arg14[%c0_57, %c0_58, %c0_59] : memref<2x2x32xf32, #tpu.memory_space<vmem>>, vector<2x2x32xf32>
    tpu.vector_store %arg14[%c0_57, %c0_58, %c0_59], %329 {strides = array<i32>} : memref<2x2x32xf32, #tpu.memory_space<vmem>>, vector<2x2x32xf32>,
    %331 = vector.shape_cast %160 : vector<2x32xf32> to vector<1x2x32xf32>
    %332 = vector.shape_cast %323 : vector<2x32xf32> to vector<1x2x32xf32>
    %333 = tpu.concatenate %331, %332 in 0 : vector<1x2x32xf32>, vector<1x2x32xf32> -> vector<2x2x32xf32>
    %c0_60 = arith.constant 0 : index
    %c0_61 = arith.constant 0 : index
    %c0_62 = arith.constant 0 : index
    %334 = vector.load %arg15[%c0_60, %c0_61, %c0_62] : memref<2x2x32xf32, #tpu.memory_space<vmem>>, vector<2x2x32xf32>
    tpu.vector_store %arg15[%c0_60, %c0_61, %c0_62], %333 {strides = array<i32>} : memref<2x2x32xf32, #tpu.memory_space<vmem>>, vector<2x2x32xf32>,
    %c0_63 = arith.constant 0 : index
    %c0_64 = arith.constant 0 : index
    %335 = vector.load %arg9[%c0_63, %c0_64] : memref<32x45xf32, #tpu.memory_space<vmem>>, vector<32x45xf32>
    %cst_65 = arith.constant dense<0.000000e+00> : vector<16x45xf32>
    %336 = tpu.matmul %326, %335, %cst_65 {dimension_numbers = #tpu.dot_dimension_numbers<[1], [0], [0], [1], [0, 0, 1, 1], [], []>} : vector<16x32xf32>, vector<32x45xf32>, vector<16x45xf32> -> vector<16x45xf32>
    %c0_66 = arith.constant 0 : index
    %c0_67 = arith.constant 0 : index
    %337 = vector.load %arg10[%c0_66, %c0_67] : memref<1x45xf32, #tpu.memory_space<vmem>>, vector<1x45xf32>
    %338 = vector.broadcast %337 : vector<1x45xf32> to vector<16x45xf32>
    %339 = arith.addf %336, %338 : vector<16x45xf32>
    %c0_68 = arith.constant 0 : index
    %c0_69 = arith.constant 0 : index
    %340 = vector.load %arg12[%c0_68, %c0_69] : memref<1x45xf32, #tpu.memory_space<vmem>>, vector<1x45xf32>
    %cst_70 = arith.constant 5.000000e-01 : f32
    %341 = vector.broadcast %cst_70 : f32 to vector<1x45xf32>
    %342 = arith.cmpf ogt, %340, %341 : vector<1x45xf32>
    %cst_71 = arith.constant -1.000000e+30 : f32
    %343 = vector.shape_cast %342 : vector<1x45xi1> to vector<1x45xi1>
    %344 = vector.broadcast %343 : vector<1x45xi1> to vector<16x45xi1>
    %345 = vector.broadcast %cst_71 : f32 to vector<16x45xf32>
    %346 = arith.select %344, %339, %345 : vector<16x45xi1>, vector<16x45xf32>
    %347 = math.exp %346 : vector<16x45xf32>
    %c0_72 = arith.constant 0 : index
    %c0_73 = arith.constant 0 : index
    %348 = vector.load %arg11[%c0_72, %c0_73] : memref<45x45xf32, #tpu.memory_space<vmem>>, vector<45x45xf32>
    %cst_74 = arith.constant dense<0.000000e+00> : vector<16x45xf32>
    %349 = tpu.matmul %347, %348, %cst_74 {dimension_numbers = #tpu.dot_dimension_numbers<[1], [0], [0], [1], [0, 0, 1, 1], [], []>} : vector<16x45xf32>, vector<45x45xf32>, vector<16x45xf32> -> vector<16x45xf32>
    %cst_75 = arith.constant 1.000000e+00 : f32
    %350 = vector.shape_cast %342 : vector<1x45xi1> to vector<1x45xi1>
    %351 = vector.broadcast %350 : vector<1x45xi1> to vector<16x45xi1>
    %352 = vector.broadcast %cst_75 : f32 to vector<16x45xf32>
    %353 = arith.select %351, %349, %352 : vector<16x45xi1>, vector<16x45xf32>
    %354 = math.log %353 : vector<16x45xf32>
    %355 = arith.subf %339, %354 : vector<16x45xf32>
    %c0_76 = arith.constant 0 : index
    %c0_77 = arith.constant 0 : index
    %356 = vector.load %arg13[%c0_76, %c0_77] : memref<16x45xf32, #tpu.memory_space<vmem>>, vector<16x45xf32>
    tpu.vector_store %arg13[%c0_76, %c0_77], %355 {strides = array<i32>} : memref<16x45xf32, #tpu.memory_space<vmem>>, vector<16x45xf32>,
    return
  }
}

</mosaic_0001>

<bundles_post_ra>
// kernel: mdmrnn_forward.1
= control target key start
LH: loop header
LB: loop body
LE: loop exit
PB: predicated region body
PF: predicated region fallthrough
CT: control target
= control target key end

     0   :  { %21 = vsyncpa [#allocation3], 0  ;;  %s3610_s0 = inlined_call_operand.vmem [shape: f32[16,4], index: 0, kind: input, shape index: {}]   ;;  %s3611_s1 = inlined_call_operand.vmem [shape: f32[2,2,32], index: 1, kind: input, shape index: {}]   ;;  %s3612_s2 = inlined_call_operand.vmem [shape: f32[2,2,32], index: 2, kind: input, shape index: {}]   ;;  %s3613_s3 = inlined_call_operand.vmem [shape: f32[4,128], index: 3, kind: input, shape index: {}]   ;;  %s3614_s4 = inlined_call_operand.hbm [shape: f32[32,128], index: 4, kind: input, shape index: {}]   ;;  %s3615_s5 = inlined_call_operand.vmem [shape: f32[1,128], index: 5, kind: input, shape index: {}]   ;;  %s3616_s6 = inlined_call_operand.hbm [shape: f32[32,128], index: 6, kind: input, shape index: {}]   ;;  %s3617_s7 = inlined_call_operand.hbm [shape: f32[32,128], index: 7, kind: input, shape index: {}]   ;;  %s3618_s8 = inlined_call_operand.vmem [shape: f32[1,128], index: 8, kind: input, shape index: {}]   ;;  %s3619_s9 = inlined_call_operand.hbm [shape: f32[32,45], index: 9, kind: input, shape index: {}]   ;;  %s3620_s10 = inlined_call_operand.vmem [shape: f32[1,45], index: 10, kind: input, shape index: {}]   ;;  %s3621_s11 = inlined_call_operand.vmem [shape: f32[45,45], index: 11, kind: input, shape index: {}]   ;;  %s3622_s12 = inlined_call_operand.vmem [shape: f32[1,45], index: 12, kind: input, shape index: {}]   ;;  %s3623_s13 = inlined_call_operand.vmem [shape: f32[16,45], index: 13, kind: output, shape index: {0}]   ;;  %s3624_s14 = inlined_call_operand.hbm [shape: f32[2,2,32], index: 14, kind: output, shape index: {1}]   ;;  %s3625_s15 = inlined_call_operand.hbm [shape: f32[2,2,32], index: 15, kind: output, shape index: {2}]  }
   0x1   :  { %22 = vsyncpa [#allocation6], 0 }
   0x2   :  { %23 = vsyncpa [#allocation9], 0 }
   0x3   :  { %24 = vsyncpa [#allocation4], 0 }
   0x4   :  { %25 = vsyncpa [#allocation12], 0  ;;  %s3078_s18 = smov [#allocation5]   ;;  %s3079_s20 = smov [#allocation2]  }
   0x5   :  { %s53_s19 = sshll.u32 %s3078_s18, 4  ;;  %s39_s21 = sshll.u32 %s3079_s20, 4  ;;  %s54_s19 = int_to_ptr.vmem [resolvable:$true] %s53_s19  ;;  %s3175_s21 = int_to_ptr.vmem [resolvable:$true] %s39_s21 }
   0x6   :  { %s2936_s24 = scalar_lea.hbm %s3616_s6, 512 }
   0x7   :  { %p2937_p0 = scmp.ne.s32.totalorder %s3616_s6, %s2936_s24  ;;  %p2940_p1 = scmp.lt.u32.totalorder %s2936_s24, %s3616_s6 }
   0x9   :  { %p2942_p2 = pnand %p2940_p1, %p2937_p0 }
   0xb   :  { %2945 = shalt.err (!%p2942_p2)
}
   0xc   :  { %s2946_s29 = scalar_lea.vmem %s54_s19, 512  ;;  %p2951_p4 = scmp.lt.s32.totalorder %s54_s19, %s54_s19 }
   0xd   :  { %p2947_p3 = scmp.ne.s32.totalorder %s54_s19, %s2946_s29  ;;  %p2952_p5 = scmp.lt.s32.totalorder %s2946_s29, %s2946_s29 }
   0xf   :  { %p2953_p6 = por %p2952_p5, %p2951_p4 }
  0x11   :  { %p2954_p7 = pnand %p2953_p6, %p2947_p3 }
  0x13   :  { %2957 = shalt.err (!%p2954_p7)
}
  0x14   :  { %s3080_s30 = smov 128   ;;  %s3081_s16 = smov 8  }
  0x15   :  { %59 = dma.hbm_to_vmem [thread:$0]  %s3616_s6, 512, %s54_s19, [#allocation6], %s3080_s30, %s3080_s30, %s3081_s16  }
  0x16   :  { %s2958_s23 = scalar_lea.hbm %s3614_s4, 512 }
  0x17   :  { %p2959_p8 = scmp.ne.s32.totalorder %s3614_s4, %s2958_s23  ;;  %p2962_p9 = scmp.lt.u32.totalorder %s2958_s23, %s3614_s4 }
  0x19   :  { %p2964_p10 = pnand %p2962_p9, %p2959_p8 }
  0x1b   :  { %2967 = shalt.err (!%p2964_p10)
}
  0x1c   :  { %s2968_s28 = scalar_lea.vmem %s3175_s21, 512  ;;  %p2973_p12 = scmp.lt.s32.totalorder %s3175_s21, %s3175_s21 }
  0x1d   :  { %p2969_p11 = scmp.ne.s32.totalorder %s3175_s21, %s2968_s28  ;;  %p2974_p13 = scmp.lt.s32.totalorder %s2968_s28, %s2968_s28 }
  0x1f   :  { %p2975_p0 = por %p2974_p13, %p2973_p12 }
  0x21   :  { %p2976_p1 = pnand %p2975_p0, %p2969_p11 }
  0x23   :  { %2979 = shalt.err (!%p2976_p1)
}
  0x24   :  { %45 = dma.hbm_to_vmem [thread:$0]  %s3614_s4, 512, %s3175_s21, [#allocation3], %s3080_s30, %s3080_s30, %s3081_s16  }
  0x25   :  { %s3082_s29 = smov [#allocation7]   ;;  %s3083_s18 = smov [#allocation8]  }
  0x26   :  { %s65_s17 = sshll.u32 %s3082_s29, 4  ;;  %s79_s20 = sshll.u32 %s3083_s18, 4  ;;  %s66_s17 = int_to_ptr.vmem [resolvable:$true] %s65_s17  ;;  %s3212_s20 = int_to_ptr.vmem [resolvable:$true] %s79_s20 }
  0x27   :  { %s2980_s24 = scalar_lea.hbm %s3617_s7, 512 }
  0x28   :  { %p2981_p2 = scmp.ne.s32.totalorder %s3617_s7, %s2980_s24  ;;  %p2984_p3 = scmp.lt.u32.totalorder %s2980_s24, %s3617_s7 }
  0x2a   :  { %p2986_p4 = pnand %p2984_p3, %p2981_p2 }
  0x2c   :  { %2989 = shalt.err (!%p2986_p4)
}
  0x2d   :  { %s2990_s4 = scalar_lea.vmem %s66_s17, 512  ;;  %p2995_p6 = scmp.lt.s32.totalorder %s66_s17, %s66_s17 }
  0x2e   :  { %p2991_p5 = scmp.ne.s32.totalorder %s66_s17, %s2990_s4  ;;  %p2996_p7 = scmp.lt.s32.totalorder %s2990_s4, %s2990_s4 }
  0x30   :  { %p2997_p8 = por %p2996_p7, %p2995_p6 }
  0x32   :  { %p2998_p9 = pnand %p2997_p8, %p2991_p5 }
  0x34   :  { %3001 = shalt.err (!%p2998_p9)
}
  0x35   :  { %71 = dma.hbm_to_vmem [thread:$0]  %s3617_s7, 512, %s66_s17, [#allocation6], %s3080_s30, %s3080_s30, %s3081_s16  }
  0x36   :  { %s3002_s18 = scalar_lea.hbm %s3619_s9, 512 }
  0x37   :  { %p3003_p10 = scmp.ne.s32.totalorder %s3619_s9, %s3002_s18  ;;  %p3006_p11 = scmp.lt.u32.totalorder %s3002_s18, %s3619_s9 }
  0x39   :  { %p3008_p12 = pnand %p3006_p11, %p3003_p10 }
  0x3b   :  { %3011 = shalt.err (!%p3008_p12)
}
  0x3c   :  { %s3012_s26 = scalar_lea.vmem %s3212_s20, 512  ;;  %p3017_p0 = scmp.lt.s32.totalorder %s3212_s20, %s3212_s20 }
  0x3d   :  { %p3013_p13 = scmp.ne.s32.totalorder %s3212_s20, %s3012_s26  ;;  %p3018_p1 = scmp.lt.s32.totalorder %s3012_s26, %s3012_s26 }
  0x3f   :  { %p3019_p2 = por %p3018_p1, %p3017_p0 }
  0x41   :  { %p3020_p3 = pnand %p3019_p2, %p3013_p13 }
  0x43   :  { %3023 = shalt.err (!%p3020_p3)
}
  0x44   :  { %85 = dma.hbm_to_vmem [thread:$0]  %s3619_s9, 512, %s3212_s20, [#allocation9], %s3080_s30, %s3080_s30, %s3081_s16  }
  0x45   :  { %3068 = dma.done.wait [#allocation3], 512  }
  0x46   :  { %3069 = vsyncadd [#allocation3], 4294966784 }
  0x47   :  { %3070 = dma.done.wait [#allocation6], 1024  }
  0x48   :  { %3071 = vsyncadd [#allocation6], 4294966272 }
  0x49   :  { %3072 = dma.done.wait [#allocation9], 512  }
  0x4a   :  { %3073 = vsyncadd [#allocation9], 4294966784  ;;  %v3084_v0 = vmov 0.0|0.0   ;;  %vm3085_vm0 = vmmov 0   ;;  %v3086_v1 = vmov 0.0   ;;  %vm121_vm1 = vcmask 1043456  }
  0x4b   :  { %2657 = vmatprep.subr.bf16.mxu0 %v3084_v0  ;;  %2452 = vmatprep.mubr.msk.f32.mxu0 %vm3085_vm0, %v3086_v1  ;;  %vm114_vm2 = vcmask 31744   ;;  %v200_v2 = vld [vmem:[#allocation2] sm:$0xff]  ;;  %v201_v3 = vld [vmem:[#allocation2 + $0x8] sm:$0xff]  ;;  %v106_v4 = vld [vmem:[%s3613_s3] sm:$0xf]  ;;  %vm206_vm3 = vcmask 261120  }
  0x4c   :  { %v3255_v5 = vpack.c.bf16 %v201_v3, %v200_v2  ;;  %2439 = vmatprep.subr.msk.mxu1 %vm121_vm1, %v106_v4  ;;  %v104_v6 = vld [vmem:[%s3610_s0] sm:$0xff]  ;;  %v105_v7 = vld [vmem:[%s3610_s0 + $0x8] sm:$0xff]  ;;  %s3087_s6 = smov 32   ;;  %vm1053_vm4 = vcmask 1041408   ;;  %vm1056_vm5 = vcmask 1045504   ;;  %vm2025_vm6 = vcmask 261126  }
  0x4d   :  { %v202_v8 = vld [vmem:[#allocation2 + $0x10] sm:$0xff]  ;;  %2440 = vmatpush3.msk.msra.mxu1 %vm121_vm1, %v106_v4  ;;  %2441 = vmatprep.mubr.msk.f32.mxu1 %vm114_vm2, %v104_v6  ;;  %v203_v9 = vld [vmem:[#allocation2 + $0x18] sm:$0xff]  ;;  %vm2161_vm7 = vcmask 1044480   ;;  %vm3090_vm8 = vmmov 1   ;;  %vm2154_vm12 = vcmask 367616   ;;  %s3093_s29 = smov [#allocation11]  }
  0x4e   :  { %2659 = vmatpush3.bf16.msra.mxu0 %v3255_v5  ;;  %2442 = vmatmul.mubr.msk.f32.vlgmr.msra.gmra.mrb[0].mxu1 %vm114_vm2, %v105_v7  ;;  %v3266_v10 = vpack.c.bf16 %v203_v9, %v202_v8  ;;  %v204_v11 = vld [vmem:[%s3611_s1] sm:$0x3]  ;;  %vm2778_vm9 = vmpackc.low %vm2161_vm7, %vm3090_vm8 }
  0x4f   :  { %2660 = vmatprep.subr.bf16.mxu0 %v3084_v0  ;;  %2669 = vmatprep.subr.bf16.mxu1 %v3084_v0  ;;  %v2289_v12 = vld [vmem:[%s3615_s5] ss:$0 sm:$0xff]  ;;  %s3088_s5 = smov 64  }
  0x50   :  { %2671 = vmatpush3.bf16.msra.mxu1 %v3255_v5  ;;  %2474 = vmatprep.mubr.msk.f32.mxu1 %vm3085_vm0, %v3086_v1  ;;  %v205_v21 = vld [vmem:[%s3612_s2] sm:$0x3] }
  0x51   :  { %2672 = vmatprep.subr.bf16.mxu1 %v3084_v0 }
  0x52   :  { %2662 = vmatpush3.bf16.msra.mxu0 %v3266_v10 }
  0x53   :  { %2663 = vmatprep.subr.bf16.mxu0 %v3084_v0 }
  0x54   :  { %2674 = vmatpush3.bf16.msra.mxu1 %v3266_v10 }
  0x55   :  { %2453 = vmatmul.mubr.msk.f32.vlgmr.msra.gmra.mrb[0].mxu0 %vm206_vm3, %v204_v11  ;;  %2681 = vmatprep.subr.bf16.mxu1 %v3084_v0 }
  0x56   :  { %2665 = vmatpush3.bf16.msra.mxu0 %v3255_v5  ;;  %2463 = vmatprep.mubr.msk.f32.mxu0 %vm3085_vm0, %v3086_v1 }
  0x57   :  { %2666 = vmatprep.subr.bf16.mxu0 %v3084_v0 }
  0x5a   :  { %2668 = vmatpush3.bf16.msra.mxu0 %v3266_v10 }
  0x5b   :  { %2675 = vmatprep.subr.bf16.mxu0 %v3084_v0 }
 0x121   :  { %v2443_v13 = vpop.f32.mrb[0].mxu1 }
 0x122   :  { %v3291_v14 = vadd.f32 %v2443_v13, %v2289_v12  ;;  %v191_v15 = vpop.f32.mrb[1].mxu1 }
 0x123   :  { %v3293_v16 = vadd.f32 %v2289_v12, %v191_v15 }
 0x128   :  { %v276_v17 = vpop.f32.mrb[0].mxu0 }
 0x129   :  { %v280_v18 = vadd.f32 %v276_v17, %v3293_v16  ;;  %v2454_v19 = vpop.f32.mrb[1].mxu0 }
 0x12b   :  { %2800 = vtanh.f32 %v280_v18  ;;  %v2294_v22 = vmul.f32 -1.442695, %v280_v18 }
 0x12d   :  { %2802 = vpow2.f32 %v2294_v22 }
 0x135   :  { %v2801_v20 = vpop.eup %2800 }
 0x136   :  { %294 = vrot.lane.b32.xlu0 %v2801_v20, %s3087_s6 }
 0x137   :  { %v2803_v23 = vpop.eup %2802 }
 0x138   :  { %v284_v24 = vadd.f32 1.0, %v2803_v23 }
 0x13a   :  { %289 = vrot.lane.b32.xlu0 %v205_v21, %s3087_s6  ;;  %2804 = vrcp.f32 %v284_v24 }
 0x144   :  { %v2805_v25 = vpop.eup %2804 }
 0x1a8   :  { %v295_v26 = vpop.permute.xlu0 %294 }
 0x1a9   :  { %v297_v27 = vmul.f32 %v2805_v25, %v295_v26 }
 0x1ab   :  { %299 = vrot.lane.b32.xlu1 %v297_v27, %s3087_s6 }
 0x1ac   :  { %v290_v28 = vpop.permute.xlu0 %289 }
 0x1ad   :  { %v292_v29 = vmul.f32 %v2805_v25, %v290_v28 }
 0x21d   :  { %v300_v30 = vpop.permute.xlu1 %299 }
 0x21e   :  { %v302_v31 = vadd.f32 %v300_v30, %v292_v29 }
 0x220   :  { %2806 = vtanh.f32 %v302_v31  ;;  %v396_v47 = vrot.slane %v302_v31, 6 }
 0x22a   :  { %v2807_v32 = vpop.eup %2806 }
 0x22b   :  { %305 = vrot.lane.b32.xlu1 %v2807_v32, %s3087_s6 }
 0x29d   :  { %v306_v33 = vpop.permute.xlu1 %305 }
 0x29e   :  { %v3303_v34 = vmul.f32 %v2805_v25, %v306_v33 }
 0x2a0   :  { %310 = vrot.lane.b32.xlu0 %v3303_v34, %s3088_s5 }
 0x312   :  { %v311_v35 = vpop.permute.xlu0 %310 }
 0x313   :  { %2464 = vmatmul.mubr.msk.f32.vlgmr.msra.gmra.mrb[2].mxu0 %vm206_vm3, %v311_v35 }
 0x314   :  { %2677 = vmatpush3.bf16.msra.mxu0 %v3255_v5  ;;  %2485 = vmatprep.mubr.msk.f32.mxu0 %vm3085_vm0, %v3086_v1 }
 0x315   :  { %2678 = vmatprep.subr.bf16.mxu0 %v3084_v0 }
 0x318   :  { %2680 = vmatpush3.bf16.msra.mxu0 %v3266_v10 }
 0x319   :  { %2687 = vmatprep.subr.bf16.mxu0 %v3084_v0 }
 0x3e6   :  { %v380_v36 = vpop.f32.mrb[2].mxu0 }
 0x3e7   :  { %v385_v37 = vrot.slane %v380_v36, 6  ;;  %v2465_v38 = vpop.f32.mrb[3].mxu0 }
 0x3e9   :  { %v387_v39 = vadd.f32 %v385_v37, %v3293_v16 }
 0x3eb   :  { %2808 = vtanh.f32 %v387_v39  ;;  %v2296_v41 = vmul.f32 -1.442695, %v387_v39 }
 0x3ed   :  { %2810 = vpow2.f32 %v2296_v41 }
 0x3f5   :  { %v2809_v40 = vpop.eup %2808 }
 0x3f6   :  { %400 = vrot.lane.b32.xlu1 %v2809_v40, %s3087_s6 }
 0x3f7   :  { %v2811_v42 = vpop.eup %2810 }
 0x3f8   :  { %v391_v43 = vadd.f32 1.0, %v2811_v42 }
 0x3fa   :  { %2812 = vrcp.f32 %v391_v43 }
 0x404   :  { %v2813_v44 = vpop.eup %2812 }
 0x405   :  { %v398_v48 = vmul.f32 %v2813_v44, %v396_v47 }
 0x468   :  { %v401_v45 = vpop.permute.xlu1 %400 }
 0x469   :  { %v403_v46 = vmul.f32 %v2813_v44, %v401_v45 }
 0x46b   :  { %405 = vrot.lane.b32.xlu0 %v403_v46, %s3087_s6 }
 0x4dd   :  { %v406_v49 = vpop.permute.xlu0 %405 }
 0x4de   :  { %v408_v50 = vadd.f32 %v406_v49, %v398_v48 }
 0x4e0   :  { %2814 = vtanh.f32 %v408_v50  ;;  %v503_v6 = vrot.slane %v408_v50, 6 }
 0x4ea   :  { %v2815_v51 = vpop.eup %2814 }
 0x4eb   :  { %411 = vrot.lane.b32.xlu1 %v2815_v51, %s3087_s6 }
 0x55d   :  { %v412_v52 = vpop.permute.xlu1 %411 }
 0x55e   :  { %v414_v53 = vmul.f32 %v2813_v44, %v412_v52 }
 0x560   :  { %v416_v54 = vrot.slane %v414_v53, 2  ;;  %v1054_v15 = vsel %vm1053_vm4, %v3303_v34, %v414_v53 }
 0x562   :  { %417 = vrot.lane.b32.xlu0 %v416_v54, %s3088_s5 }
 0x5d4   :  { %v418_v55 = vpop.permute.xlu0 %417 }
 0x5d5   :  { %2475 = vmatmul.mubr.msk.f32.vlgmr.msra.gmra.mrb[2].mxu1 %vm206_vm3, %v418_v55 }
 0x5d6   :  { %2683 = vmatpush3.bf16.msra.mxu1 %v3255_v5  ;;  %2496 = vmatprep.mubr.msk.f32.mxu1 %vm3085_vm0, %v3086_v1 }
 0x5d7   :  { %2684 = vmatprep.subr.bf16.mxu1 %v3084_v0 }
 0x5da   :  { %2686 = vmatpush3.bf16.msra.mxu1 %v3266_v10 }
 0x5db   :  { %2693 = vmatprep.subr.bf16.mxu1 %v3084_v0 }
 0x6a8   :  { %v487_v56 = vpop.f32.mrb[2].mxu1 }
 0x6a9   :  { %v492_v57 = vrot.slane %v487_v56, 4  ;;  %v2476_v58 = vpop.f32.mrb[3].mxu1 }
 0x6ab   :  { %v494_v59 = vadd.f32 %v492_v57, %v3293_v16 }
 0x6ad   :  { %2816 = vtanh.f32 %v494_v59  ;;  %v2298_v61 = vmul.f32 -1.442695, %v494_v59 }
 0x6af   :  { %2818 = vpow2.f32 %v2298_v61 }
 0x6b7   :  { %v2817_v60 = vpop.eup %2816 }
 0x6b8   :  { %507 = vrot.lane.b32.xlu1 %v2817_v60, %s3087_s6 }
 0x6b9   :  { %v2819_v62 = vpop.eup %2818 }
 0x6ba   :  { %v498_v63 = vadd.f32 1.0, %v2819_v62 }
 0x6bc   :  { %2820 = vrcp.f32 %v498_v63 }
 0x6c6   :  { %v2821_v2 = vpop.eup %2820 }
 0x6c7   :  { %v505_v7 = vmul.f32 %v2821_v2, %v503_v6 }
 0x72a   :  { %v508_v3 = vpop.permute.xlu1 %507 }
 0x72b   :  { %v510_v4 = vmul.f32 %v2821_v2, %v508_v3 }
 0x72d   :  { %512 = vrot.lane.b32.xlu0 %v510_v4, %s3087_s6 }
 0x79f   :  { %v513_v8 = vpop.permute.xlu0 %512 }
 0x7a0   :  { %v515_v9 = vadd.f32 %v513_v8, %v505_v7 }
 0x7a2   :  { %2822 = vtanh.f32 %v515_v9  ;;  %v610_v31 = vrot.slane %v515_v9, 6 }
 0x7ac   :  { %v2823_v11 = vpop.eup %2822 }
 0x7ad   :  { %518 = vrot.lane.b32.xlu1 %v2823_v11, %s3087_s6 }
 0x81f   :  { %v519_v12 = vpop.permute.xlu1 %518 }
 0x820   :  { %v521_v13 = vmul.f32 %v2821_v2, %v519_v12 }
 0x822   :  { %v523_v17 = vrot.slane %v521_v13, 4  ;;  %v1055_v18 = vsel %vm121_vm1, %v1054_v15, %v521_v13 }
 0x824   :  { %524 = vrot.lane.b32.xlu0 %v523_v17, %s3088_s5 }
 0x896   :  { %v525_v19 = vpop.permute.xlu0 %524 }
 0x897   :  { %2486 = vmatmul.mubr.msk.f32.vlgmr.msra.gmra.mrb[4].mxu0 %vm206_vm3, %v525_v19 }
 0x898   :  { %2689 = vmatpush3.bf16.msra.mxu0 %v3255_v5  ;;  %2507 = vmatprep.mubr.msk.f32.mxu0 %vm3085_vm0, %v3086_v1 }
 0x899   :  { %2690 = vmatprep.subr.bf16.mxu0 %v3084_v0 }
 0x89c   :  { %2692 = vmatpush3.bf16.msra.mxu0 %v3266_v10 }
 0x89d   :  { %2699 = vmatprep.subr.bf16.mxu0 %v3084_v0 }
 0x96a   :  { %v594_v20 = vpop.f32.mrb[4].mxu0 }
 0x96b   :  { %v599_v21 = vrot.slane %v594_v20, 2  ;;  %v2487_v22 = vpop.f32.mrb[5].mxu0 }
 0x96d   :  { %v601_v23 = vadd.f32 %v599_v21, %v3293_v16 }
 0x96f   :  { %2824 = vtanh.f32 %v601_v23  ;;  %v2300_v25 = vmul.f32 -1.442695, %v601_v23 }
 0x971   :  { %2826 = vpow2.f32 %v2300_v25 }
 0x979   :  { %v2825_v24 = vpop.eup %2824 }
 0x97a   :  { %614 = vrot.lane.b32.xlu1 %v2825_v24, %s3087_s6 }
 0x97b   :  { %v2827_v26 = vpop.eup %2826 }
 0x97c   :  { %v605_v27 = vadd.f32 1.0, %v2827_v26 }
 0x97e   :  { %2828 = vrcp.f32 %v605_v27 }
 0x988   :  { %v2829_v28 = vpop.eup %2828 }
 0x989   :  { %v612_v32 = vmul.f32 %v2829_v28, %v610_v31 }
 0x9ec   :  { %v615_v29 = vpop.permute.xlu1 %614 }
 0x9ed   :  { %v617_v30 = vmul.f32 %v2829_v28, %v615_v29 }
 0x9ef   :  { %619 = vrot.lane.b32.xlu0 %v617_v30, %s3087_s6 }
 0xa61   :  { %v620_v33 = vpop.permute.xlu0 %619 }
 0xa62   :  { %v622_v34 = vadd.f32 %v620_v33, %v612_v32 }
 0xa64   :  { %2830 = vtanh.f32 %v622_v34  ;;  %v714_v50 = vrot.slane %v622_v34, 6 }
 0xa6e   :  { %v2831_v16 = vpop.eup %2830 }
 0xa6f   :  { %625 = vrot.lane.b32.xlu1 %v2831_v16, %s3087_s6 }
 0xae1   :  { %v626_v35 = vpop.permute.xlu1 %625 }
 0xae2   :  { %v628_v36 = vmul.f32 %v2829_v28, %v626_v35 }
 0xae4   :  { %v630_v37 = vrot.slane %v628_v36, 6  ;;  %v3346_v38 = vsel %vm1056_vm5, %v1055_v18, %v628_v36 }
 0xae6   :  { %631 = vrot.lane.b32.xlu0 %v630_v37, %s3088_s5 }
 0xb58   :  { %v632_v39 = vpop.permute.xlu0 %631 }
 0xb59   :  { %2497 = vmatmul.mubr.msk.f32.vlgmr.msra.gmra.mrb[4].mxu1 %vm206_vm3, %v632_v39 }
 0xb5a   :  { %2695 = vmatpush3.bf16.msra.mxu1 %v3255_v5  ;;  %2518 = vmatprep.mubr.msk.f32.mxu1 %vm3085_vm0, %v3086_v1 }
 0xb5b   :  { %2696 = vmatprep.subr.bf16.mxu1 %v3084_v0 }
 0xb5e   :  { %2698 = vmatpush3.bf16.msra.mxu1 %v3266_v10 }
 0xc2c   :  { %v701_v40 = vpop.f32.mrb[4].mxu1 }
 0xc2d   :  { %v705_v41 = vadd.f32 %v701_v40, %v3291_v14  ;;  %v2498_v42 = vpop.f32.mrb[5].mxu1 }
 0xc2f   :  { %2832 = vtanh.f32 %v705_v41  ;;  %v2302_v44 = vmul.f32 -1.442695, %v705_v41 }
 0xc31   :  { %2834 = vpow2.f32 %v2302_v44 }
 0xc39   :  { %v2833_v43 = vpop.eup %2832 }
 0xc3a   :  { %718 = vrot.lane.b32.xlu1 %v2833_v43, %s3087_s6 }
 0xc3b   :  { %v2835_v45 = vpop.eup %2834 }
 0xc3c   :  { %v709_v46 = vadd.f32 1.0, %v2835_v45 }
 0xc3e   :  { %2836 = vrcp.f32 %v709_v46 }
 0xc48   :  { %v2837_v47 = vpop.eup %2836 }
 0xc49   :  { %v716_v51 = vmul.f32 %v2837_v47, %v714_v50 }
 0xcac   :  { %v719_v48 = vpop.permute.xlu1 %718 }
 0xcad   :  { %v721_v49 = vmul.f32 %v2837_v47, %v719_v48 }
 0xcaf   :  { %723 = vrot.lane.b32.xlu0 %v721_v49, %s3087_s6 }
 0xd21   :  { %v724_v52 = vpop.permute.xlu0 %723 }
 0xd22   :  { %v726_v53 = vadd.f32 %v724_v52, %v716_v51 }
 0xd24   :  { %2838 = vtanh.f32 %v726_v53 }
 0xd2e   :  { %v2839_v54 = vpop.eup %2838 }
 0xd2f   :  { %729 = vrot.lane.b32.xlu1 %v2839_v54, %s3087_s6 }
 0xda1   :  { %v730_v55 = vpop.permute.xlu1 %729 }
 0xda2   :  { %v3359_v56 = vmul.f32 %v2837_v47, %v730_v55  ;;  %v1061_v55 = vld [vmem:[#allocation5] sm:$0xff] }
 0xda4   :  { %734 = vrot.lane.b32.xlu0 %v3359_v56, %s3088_s5 }
 0xe16   :  { %v735_v57 = vpop.permute.xlu0 %734 }
 0xe17   :  { %2508 = vmatmul.mubr.msk.f32.vlgmr.msra.gmra.mrb[6].mxu0 %vm206_vm3, %v735_v57  ;;  %v1157_v57 = vld [vmem:[#allocation7] sm:$0xff] }
 0xe18   :  { %2701 = vmatpush3.bf16.msra.mxu0 %v3255_v5  ;;  %2529 = vmatprep.mubr.msk.f32.mxu0 %vm3085_vm0, %v3086_v1 }
 0xe19   :  { %2702 = vmatprep.subr.bf16.mxu0 %v3084_v0 }
 0xe1c   :  { %2704 = vmatpush3.bf16.msra.mxu0 %v3266_v10  ;;  %v820_v10 = vrot.slane %v726_v53, 6 }
 0xe1d   :  { %2713 = vmatprep.subr.bf16.mxu0 %v3084_v0 }
 0xeea   :  { %v804_v58 = vpop.f32.mrb[6].mxu0 }
 0xeeb   :  { %v809_v59 = vrot.slane %v804_v58, 6  ;;  %v2509_v60 = vpop.f32.mrb[7].mxu0 }
 0xeec   :  { %v1063_v60 = vld [vmem:[#allocation5 + $0x10] sm:$0xff] }
 0xeed   :  { %v811_v61 = vadd.f32 %v809_v59, %v3291_v14  ;;  %v1158_v59 = vld [vmem:[#allocation7 + $0x8] sm:$0xff] }
 0xeef   :  { %2840 = vtanh.f32 %v811_v61  ;;  %v2304_v63 = vmul.f32 -1.442695, %v811_v61  ;;  %v1064_v61 = vld [vmem:[#allocation5 + $0x18] sm:$0xff] }
 0xef1   :  { %2842 = vpow2.f32 %v2304_v63  ;;  %v1159_v63 = vld [vmem:[#allocation7 + $0x10] sm:$0xff] }
 0xef9   :  { %v2841_v62 = vpop.eup %2840 }
 0xefa   :  { %824 = vrot.lane.b32.xlu1 %v2841_v62, %s3087_s6  ;;  %v3396_v62 = vpack.c.bf16 %v1158_v59, %v1157_v57 }
 0xefb   :  { %v2843_v5 = vpop.eup %2842 }
 0xefc   :  { %v815_v2 = vadd.f32 1.0, %v2843_v5  ;;  %v1160_v5 = vld [vmem:[#allocation7 + $0x18] sm:$0xff] }
 0xefe   :  { %2844 = vrcp.f32 %v815_v2  ;;  %v3399_v2 = vpack.c.bf16 %v1160_v5, %v1159_v63 }
 0xf08   :  { %v2845_v3 = vpop.eup %2844 }
 0xf09   :  { %v822_v7 = vmul.f32 %v2845_v3, %v820_v10 }
 0xf6c   :  { %v825_v4 = vpop.permute.xlu1 %824 }
 0xf6d   :  { %v827_v6 = vmul.f32 %v2845_v3, %v825_v4  ;;  %v2312_v4 = vld [vmem:[%s3611_s1 + $0x2] sm:$0x3] }
 0xf6f   :  { %829 = vrot.lane.b32.xlu0 %v827_v6, %s3087_s6 }
 0xfe1   :  { %v830_v8 = vpop.permute.xlu0 %829 }
 0xfe2   :  { %v832_v9 = vadd.f32 %v830_v8, %v822_v7  ;;  %v2313_v8 = vld [vmem:[%s3612_s2 + $0x2] sm:$0x3] }
 0xfe4   :  { %2846 = vtanh.f32 %v832_v9  ;;  %v927_v29 = vrot.slane %v832_v9, 6 }
 0xfee   :  { %v2847_v11 = vpop.eup %2846 }
 0xfef   :  { %835 = vrot.lane.b32.xlu1 %v2847_v11, %s3087_s6 }
0x1061   :  { %v836_v12 = vpop.permute.xlu1 %835 }
0x1062   :  { %v838_v13 = vmul.f32 %v2845_v3, %v836_v12 }
0x1064   :  { %v840_v15 = vrot.slane %v838_v13, 2  ;;  %v1058_v35 = vsel %vm1053_vm4, %v3359_v56, %v838_v13  ;;  %v1062_v56 = vld [vmem:[#allocation5 + $0x8] sm:$0xff]  ;;  %v2309_v13 = vld [vmem:[%s3618_s8] ss:$0 sm:$0xff]  ;;  %s3089_s8 = smov 96  }
0x1065   :  { %v2705_v58 = vpack.c.bf16 %v1062_v56, %v1061_v55 }
0x1066   :  { %841 = vrot.lane.b32.xlu0 %v840_v15, %s3088_s5 }
0x1067   :  { %2706 = vmatprep.subr.bf16.mxu1 %v2705_v58 }
0x10d8   :  { %v842_v17 = vpop.permute.xlu0 %841 }
0x10d9   :  { %2519 = vmatmul.mubr.msk.f32.vlgmr.msra.gmra.mrb[6].mxu1 %vm206_vm3, %v842_v17 }
0x10da   :  { %2708 = vmatpush3.bf16.msra.mxu1 %v2705_v58 }
0x11ac   :  { %v911_v18 = vpop.f32.mrb[6].mxu1 }
0x11ad   :  { %v916_v19 = vrot.slane %v911_v18, 4  ;;  %v2520_v20 = vpop.f32.mrb[7].mxu1 }
0x11af   :  { %v918_v21 = vadd.f32 %v916_v19, %v3291_v14 }
0x11b1   :  { %2848 = vtanh.f32 %v918_v21  ;;  %v2306_v23 = vmul.f32 -1.442695, %v918_v21 }
0x11b3   :  { %2850 = vpow2.f32 %v2306_v23 }
0x11bb   :  { %v2849_v22 = vpop.eup %2848 }
0x11bc   :  { %931 = vrot.lane.b32.xlu1 %v2849_v22, %s3087_s6 }
0x11bd   :  { %v2851_v24 = vpop.eup %2850 }
0x11be   :  { %v922_v25 = vadd.f32 1.0, %v2851_v24 }
0x11c0   :  { %2852 = vrcp.f32 %v922_v25 }
0x11ca   :  { %v2853_v26 = vpop.eup %2852 }
0x11cb   :  { %v929_v30 = vmul.f32 %v2853_v26, %v927_v29 }
0x122e   :  { %v932_v27 = vpop.permute.xlu1 %931 }
0x122f   :  { %v934_v28 = vmul.f32 %v2853_v26, %v932_v27 }
0x1231   :  { %936 = vrot.lane.b32.xlu0 %v934_v28, %s3087_s6 }
0x12a3   :  { %v937_v31 = vpop.permute.xlu0 %936 }
0x12a4   :  { %v939_v32 = vadd.f32 %v937_v31, %v929_v30 }
0x12a6   :  { %2854 = vtanh.f32 %v939_v32  ;;  %v1034_v51 = vrot.slane %v939_v32, 6 }
0x12b0   :  { %v2855_v33 = vpop.eup %2854 }
0x12b1   :  { %942 = vrot.lane.b32.xlu1 %v2855_v33, %s3087_s6 }
0x1323   :  { %v943_v34 = vpop.permute.xlu1 %942 }
0x1324   :  { %v945_v16 = vmul.f32 %v2853_v26, %v943_v34 }
0x1326   :  { %v947_v36 = vrot.slane %v945_v16, 4  ;;  %v1059_v37 = vsel %vm121_vm1, %v1058_v35, %v945_v16 }
0x1328   :  { %948 = vrot.lane.b32.xlu0 %v947_v36, %s3088_s5 }
0x139a   :  { %v949_v39 = vpop.permute.xlu0 %948 }
0x139b   :  { %2530 = vmatmul.mubr.msk.f32.vlgmr.msra.gmra.mrb[8].mxu0 %vm206_vm3, %v949_v39 }
0x139c   :  { %2551 = vmatprep.mubr.msk.f32.mxu0 %vm3085_vm0, %v3086_v1  ;;  %2715 = vmatpush3.bf16.msra.mxu0 %v3396_v62 }
0x139d   :  { %2716 = vmatprep.subr.bf16.mxu0 %v3084_v0 }
0x13a0   :  { %2718 = vmatpush3.bf16.msra.mxu0 %v3399_v2 }
0x13a1   :  { %2725 = vmatprep.subr.bf16.mxu0 %v3084_v0 }
0x13a3   :  { %2552 = vmatmul.mubr.msk.f32.vlgmr.msra.gmra.mrb[10].mxu0 %vm206_vm3, %v2312_v4 }
0x13a4   :  { %2727 = vmatpush3.bf16.msra.mxu0 %v3396_v62  ;;  %2573 = vmatprep.mubr.msk.f32.mxu0 %vm3085_vm0, %v3086_v1 }
0x13a5   :  { %2728 = vmatprep.subr.bf16.mxu0 %v3084_v0 }
0x13a8   :  { %2730 = vmatpush3.bf16.msra.mxu0 %v3399_v2 }
0x13a9   :  { %2737 = vmatprep.subr.bf16.mxu0 %v3084_v0 }
0x146e   :  { %v1018_v40 = vpop.f32.mrb[8].mxu0 }
0x146f   :  { %v1023_v41 = vrot.slane %v1018_v40, 2  ;;  %v2531_v42 = vpop.f32.mrb[9].mxu0 }
0x1471   :  { %v1025_v43 = vadd.f32 %v1023_v41, %v3291_v14 }
0x1473   :  { %2856 = vtanh.f32 %v1025_v43  ;;  %v2308_v45 = vmul.f32 -1.442695, %v1025_v43 }
0x1475   :  { %2858 = vpow2.f32 %v2308_v45 }
0x1476   :  { %v1234_v11 = vpop.f32.mrb[10].mxu0 }
0x1477   :  { %v2553_v12 = vpop.f32.mrb[11].mxu0 }
0x147d   :  { %v2857_v44 = vpop.eup %2856 }
0x147e   :  { %1038 = vrot.lane.b32.xlu1 %v2857_v44, %s3087_s6 }
0x147f   :  { %v2859_v46 = vpop.eup %2858 }
0x1480   :  { %v1029_v47 = vadd.f32 1.0, %v2859_v46 }
0x1482   :  { %2860 = vrcp.f32 %v1029_v47 }
0x148c   :  { %v2861_v48 = vpop.eup %2860 }
0x148d   :  { %v1036_v52 = vmul.f32 %v2861_v48, %v1034_v51 }
0x14f0   :  { %v1039_v49 = vpop.permute.xlu1 %1038 }
0x14f1   :  { %v1041_v50 = vmul.f32 %v2861_v48, %v1039_v49 }
0x14f3   :  { %1043 = vrot.lane.b32.xlu0 %v1041_v50, %s3087_s6 }
0x14f7   :  { %1074 = vrot.lane.b32.xlu0 %v3346_v38, %s3088_s5  ;;  %v2709_v38 = vpack.c.bf16 %v1064_v61, %v1063_v60 }
0x14f9   :  { %2710 = vmatprep.subr.bf16.mxu1 %v2709_v38 }
0x14fa   :  { %2712 = vmatpush3.bf16.msra.mxu1 %v2709_v38 }
0x14fb   :  { %2719 = vmatprep.subr.bf16.mxu1 %v3084_v0 }
0x1565   :  { %v1044_v14 = vpop.permute.xlu0 %1043 }
0x1566   :  { %v3392_v53 = vadd.f32 %v1044_v14, %v1036_v52 }
0x1568   :  { %2862 = vtanh.f32 %v3392_v53 }
0x1569   :  { %v1075_v54 = vpop.permute.xlu0 %1074 }
0x156a   :  { %2540 = vmatprep.mubr.msk.f32.mxu1 %vm206_vm3, %v1075_v54 }
0x1572   :  { %v2863_v3 = vpop.eup %2862 }
0x1573   :  { %1049 = vrot.lane.b32.xlu1 %v2863_v3, %s3087_s6 }
0x15e5   :  { %v1050_v6 = vpop.permute.xlu1 %1049 }
0x15e6   :  { %v3416_v10 = vmul.f32 %v2861_v48, %v1050_v6 }
0x15e8   :  { %v1060_v7 = vsel %vm1056_vm5, %v1059_v37, %v3416_v10 }
0x15e9   :  { %1076 = vrot.lane.b32.xlu1 %v1060_v7, %s3088_s5 }
0x15ed   :  { %1247 = vrot.lane.b32.xlu1 %v2313_v8, %s3087_s6 }
0x165b   :  { %v1077_v9 = vpop.permute.xlu1 %1076 }
0x165c   :  { %2541 = vmatmul.mubr.msk.f32.vlgmr.msra.gmra.mrb[8].mxu1 %vm206_vm3, %v1077_v9 }
0x165d   :  { %2721 = vmatpush3.bf16.msra.mxu1 %v3396_v62  ;;  %2562 = vmatprep.mubr.msk.f32.mxu1 %vm3085_vm0, %v3086_v1 }
0x165e   :  { %2722 = vmatprep.subr.bf16.mxu1 %v3084_v0 }
0x165f   :  { %v1248_v28 = vpop.permute.xlu1 %1247 }
0x1661   :  { %2724 = vmatpush3.bf16.msra.mxu1 %v3399_v2 }
0x1662   :  { %2731 = vmatprep.subr.bf16.mxu1 %v3084_v0 }
0x172f   :  { %v2542_v15 = vpop.f32.mrb[8].mxu1 }
0x1730   :  { %v3435_v17 = vadd.f32 %v2542_v15, %v2309_v13  ;;  %v1148_v18 = vpop.f32.mrb[9].mxu1 }
0x1731   :  { %v3437_v19 = vadd.f32 %v2309_v13, %v1148_v18 }
0x1733   :  { %v1238_v20 = vadd.f32 %v1234_v11, %v3437_v19 }
0x1735   :  { %2864 = vtanh.f32 %v1238_v20  ;;  %v2315_v22 = vmul.f32 -1.442695, %v1238_v20 }
0x1737   :  { %2866 = vpow2.f32 %v2315_v22 }
0x173f   :  { %v2865_v21 = vpop.eup %2864 }
0x1740   :  { %1252 = vrot.lane.b32.xlu0 %v2865_v21, %s3087_s6 }
0x1741   :  { %v2867_v23 = vpop.eup %2866 }
0x1742   :  { %v1242_v24 = vadd.f32 1.0, %v2867_v23 }
0x1744   :  { %2868 = vrcp.f32 %v1242_v24 }
0x174e   :  { %v2869_v25 = vpop.eup %2868 }
0x174f   :  { %v1250_v29 = vmul.f32 %v2869_v25, %v1248_v28 }
0x17b2   :  { %v1253_v26 = vpop.permute.xlu0 %1252 }
0x17b3   :  { %v1255_v27 = vmul.f32 %v2869_v25, %v1253_v26 }
0x17b5   :  { %1257 = vrot.lane.b32.xlu0 %v1255_v27, %s3087_s6 }
0x1827   :  { %v1258_v30 = vpop.permute.xlu0 %1257 }
0x1828   :  { %v1260_v31 = vadd.f32 %v1258_v30, %v1250_v29 }
0x182a   :  { %2870 = vtanh.f32 %v1260_v31  ;;  %v1354_v47 = vrot.slane %v1260_v31, 6 }
0x1834   :  { %v2871_v32 = vpop.eup %2870 }
0x1835   :  { %1263 = vrot.lane.b32.xlu1 %v2871_v32, %s3087_s6 }
0x18a7   :  { %v1264_v33 = vpop.permute.xlu1 %1263 }
0x18a8   :  { %v3443_v34 = vmul.f32 %v2869_v25, %v1264_v33 }
0x18aa   :  { %1268 = vrot.lane.b32.xlu0 %v3443_v34, %s3088_s5 }
0x191c   :  { %v1269_v16 = vpop.permute.xlu0 %1268 }
0x191d   :  { %2563 = vmatmul.mubr.msk.f32.vlgmr.msra.gmra.mrb[10].mxu1 %vm206_vm3, %v1269_v16 }
0x191e   :  { %2733 = vmatpush3.bf16.msra.mxu1 %v3396_v62  ;;  %2584 = vmatprep.mubr.msk.f32.mxu1 %vm3085_vm0, %v3086_v1 }
0x191f   :  { %2734 = vmatprep.subr.bf16.mxu1 %v3084_v0 }
0x1922   :  { %2736 = vmatpush3.bf16.msra.mxu1 %v3399_v2 }
0x1923   :  { %2743 = vmatprep.subr.bf16.mxu1 %v3084_v0 }
0x19f0   :  { %v1338_v35 = vpop.f32.mrb[10].mxu1 }
0x19f1   :  { %v1343_v36 = vrot.slane %v1338_v35, 6  ;;  %v2564_v37 = vpop.f32.mrb[11].mxu1 }
0x19f3   :  { %v1345_v39 = vadd.f32 %v1343_v36, %v3437_v19 }
0x19f5   :  { %2872 = vtanh.f32 %v1345_v39  ;;  %v2317_v41 = vmul.f32 -1.442695, %v1345_v39 }
0x19f7   :  { %2874 = vpow2.f32 %v2317_v41 }
0x19ff   :  { %v2873_v40 = vpop.eup %2872 }
0x1a00   :  { %1358 = vrot.lane.b32.xlu1 %v2873_v40, %s3087_s6 }
0x1a01   :  { %v2875_v42 = vpop.eup %2874 }
0x1a02   :  { %v1349_v43 = vadd.f32 1.0, %v2875_v42 }
0x1a04   :  { %2876 = vrcp.f32 %v1349_v43 }
0x1a0e   :  { %v2877_v44 = vpop.eup %2876 }
0x1a0f   :  { %v1356_v48 = vmul.f32 %v2877_v44, %v1354_v47 }
0x1a72   :  { %v1359_v45 = vpop.permute.xlu1 %1358 }
0x1a73   :  { %v1361_v46 = vmul.f32 %v2877_v44, %v1359_v45 }
0x1a75   :  { %1363 = vrot.lane.b32.xlu0 %v1361_v46, %s3087_s6 }
0x1ae7   :  { %v1364_v49 = vpop.permute.xlu0 %1363 }
0x1ae8   :  { %v1366_v50 = vadd.f32 %v1364_v49, %v1356_v48 }
0x1aea   :  { %2878 = vtanh.f32 %v1366_v50  ;;  %v1461_v6 = vrot.slane %v1366_v50, 6 }
0x1af4   :  { %v2879_v51 = vpop.eup %2878 }
0x1af5   :  { %1369 = vrot.lane.b32.xlu1 %v2879_v51, %s3087_s6 }
0x1b67   :  { %v1370_v52 = vpop.permute.xlu1 %1369 }
0x1b68   :  { %v1372_v14 = vmul.f32 %v2877_v44, %v1370_v52 }
0x1b6a   :  { %v1374_v54 = vrot.slane %v1372_v14, 2  ;;  %v2011_v15 = vsel %vm1053_vm4, %v3443_v34, %v1372_v14 }
0x1b6c   :  { %1375 = vrot.lane.b32.xlu0 %v1374_v54, %s3088_s5 }
0x1bde   :  { %v1376_v55 = vpop.permute.xlu0 %1375 }
0x1bdf   :  { %2574 = vmatmul.mubr.msk.f32.vlgmr.msra.gmra.mrb[12].mxu0 %vm206_vm3, %v1376_v55 }
0x1be0   :  { %2739 = vmatpush3.bf16.msra.mxu0 %v3396_v62  ;;  %2595 = vmatprep.mubr.msk.f32.mxu0 %vm3085_vm0, %v3086_v1 }
0x1be1   :  { %2740 = vmatprep.subr.bf16.mxu0 %v3084_v0 }
0x1be4   :  { %2742 = vmatpush3.bf16.msra.mxu0 %v3399_v2 }
0x1be5   :  { %2749 = vmatprep.subr.bf16.mxu0 %v3084_v0 }
0x1cb2   :  { %v1445_v56 = vpop.f32.mrb[12].mxu0 }
0x1cb3   :  { %v1450_v57 = vrot.slane %v1445_v56, 4  ;;  %v2575_v58 = vpop.f32.mrb[13].mxu0 }
0x1cb5   :  { %v1452_v59 = vadd.f32 %v1450_v57, %v3437_v19 }
0x1cb7   :  { %2880 = vtanh.f32 %v1452_v59  ;;  %v2319_v61 = vmul.f32 -1.442695, %v1452_v59 }
0x1cb9   :  { %2882 = vpow2.f32 %v2319_v61 }
0x1cc1   :  { %v2881_v60 = vpop.eup %2880 }
0x1cc2   :  { %1465 = vrot.lane.b32.xlu1 %v2881_v60, %s3087_s6 }
0x1cc3   :  { %v2883_v38 = vpop.eup %2882 }
0x1cc4   :  { %v1456_v63 = vadd.f32 1.0, %v2883_v38 }
0x1cc6   :  { %2884 = vrcp.f32 %v1456_v63 }
0x1cd0   :  { %v2885_v5 = vpop.eup %2884 }
0x1cd1   :  { %v1463_v7 = vmul.f32 %v2885_v5, %v1461_v6 }
0x1d34   :  { %v1466_v3 = vpop.permute.xlu1 %1465 }
0x1d35   :  { %v1468_v4 = vmul.f32 %v2885_v5, %v1466_v3 }
0x1d37   :  { %1470 = vrot.lane.b32.xlu0 %v1468_v4, %s3087_s6 }
0x1da9   :  { %v1471_v8 = vpop.permute.xlu0 %1470 }
0x1daa   :  { %v1473_v9 = vadd.f32 %v1471_v8, %v1463_v7 }
0x1dac   :  { %2886 = vtanh.f32 %v1473_v9  ;;  %v1568_v33 = vrot.slane %v1473_v9, 6 }
0x1db6   :  { %v2887_v11 = vpop.eup %2886 }
0x1db7   :  { %1476 = vrot.lane.b32.xlu1 %v2887_v11, %s3087_s6 }
0x1e29   :  { %v1477_v12 = vpop.permute.xlu1 %1476 }
0x1e2a   :  { %v1479_v13 = vmul.f32 %v2885_v5, %v1477_v12 }
0x1e2c   :  { %v1481_v18 = vrot.slane %v1479_v13, 4  ;;  %v2012_v20 = vsel %vm121_vm1, %v2011_v15, %v1479_v13 }
0x1e2e   :  { %1482 = vrot.lane.b32.xlu0 %v1481_v18, %s3088_s5 }
0x1ea0   :  { %v1483_v21 = vpop.permute.xlu0 %1482 }
0x1ea1   :  { %2585 = vmatmul.mubr.msk.f32.vlgmr.msra.gmra.mrb[12].mxu1 %vm206_vm3, %v1483_v21 }
0x1ea2   :  { %2745 = vmatpush3.bf16.msra.mxu1 %v3396_v62  ;;  %2606 = vmatprep.mubr.msk.f32.mxu1 %vm3085_vm0, %v3086_v1 }
0x1ea3   :  { %2746 = vmatprep.subr.bf16.mxu1 %v3084_v0 }
0x1ea6   :  { %2748 = vmatpush3.bf16.msra.mxu1 %v3399_v2 }
0x1ea7   :  { %2755 = vmatprep.subr.bf16.mxu1 %v3084_v0 }
0x1f74   :  { %v1552_v22 = vpop.f32.mrb[12].mxu1 }
0x1f75   :  { %v1557_v23 = vrot.slane %v1552_v22, 2  ;;  %v2586_v24 = vpop.f32.mrb[13].mxu1 }
0x1f77   :  { %v1559_v25 = vadd.f32 %v1557_v23, %v3437_v19 }
0x1f79   :  { %2888 = vtanh.f32 %v1559_v25  ;;  %v2321_v27 = vmul.f32 -1.442695, %v1559_v25 }
0x1f7b   :  { %2890 = vpow2.f32 %v2321_v27 }
0x1f83   :  { %v2889_v26 = vpop.eup %2888 }
0x1f84   :  { %1572 = vrot.lane.b32.xlu1 %v2889_v26, %s3087_s6 }
0x1f85   :  { %v2891_v28 = vpop.eup %2890 }
0x1f86   :  { %v1563_v29 = vadd.f32 1.0, %v2891_v28 }
0x1f88   :  { %2892 = vrcp.f32 %v1563_v29 }
0x1f92   :  { %v2893_v30 = vpop.eup %2892 }
0x1f93   :  { %v1570_v34 = vmul.f32 %v2893_v30, %v1568_v33 }
0x1ff6   :  { %v1573_v31 = vpop.permute.xlu1 %1572 }
0x1ff7   :  { %v1575_v32 = vmul.f32 %v2893_v30, %v1573_v31 }
0x1ff9   :  { %1577 = vrot.lane.b32.xlu0 %v1575_v32, %s3087_s6 }
0x206b   :  { %v1578_v16 = vpop.permute.xlu0 %1577 }
0x206c   :  { %v1580_v35 = vadd.f32 %v1578_v16, %v1570_v34 }
0x206e   :  { %2894 = vtanh.f32 %v1580_v35  ;;  %v1672_v52 = vrot.slane %v1580_v35, 6 }
0x2078   :  { %v2895_v19 = vpop.eup %2894 }
0x2079   :  { %1583 = vrot.lane.b32.xlu1 %v2895_v19, %s3087_s6 }
0x20eb   :  { %v1584_v36 = vpop.permute.xlu1 %1583 }
0x20ec   :  { %v1586_v37 = vmul.f32 %v2893_v30, %v1584_v36 }
0x20ee   :  { %v1588_v39 = vrot.slane %v1586_v37, 6  ;;  %v3486_v40 = vsel %vm1056_vm5, %v2012_v20, %v1586_v37 }
0x20f0   :  { %1589 = vrot.lane.b32.xlu0 %v1588_v39, %s3088_s5 }
0x2162   :  { %v1590_v41 = vpop.permute.xlu0 %1589 }
0x2163   :  { %2596 = vmatmul.mubr.msk.f32.vlgmr.msra.gmra.mrb[14].mxu0 %vm206_vm3, %v1590_v41 }
0x2164   :  { %2751 = vmatpush3.bf16.msra.mxu0 %v3396_v62  ;;  %2617 = vmatprep.mubr.msk.f32.mxu0 %vm3085_vm0, %v3086_v1 }
0x2165   :  { %2752 = vmatprep.subr.bf16.mxu0 %v3084_v0 }
0x2168   :  { %2754 = vmatpush3.bf16.msra.mxu0 %v3399_v2 }
0x2236   :  { %v1659_v42 = vpop.f32.mrb[14].mxu0 }
0x2237   :  { %v1663_v43 = vadd.f32 %v1659_v42, %v3435_v17  ;;  %v2597_v44 = vpop.f32.mrb[15].mxu0 }
0x2239   :  { %2896 = vtanh.f32 %v1663_v43  ;;  %v2323_v46 = vmul.f32 -1.442695, %v1663_v43 }
0x223b   :  { %2898 = vpow2.f32 %v2323_v46 }
0x2243   :  { %v2897_v45 = vpop.eup %2896 }
0x2244   :  { %1676 = vrot.lane.b32.xlu1 %v2897_v45, %s3087_s6 }
0x2245   :  { %v2899_v47 = vpop.eup %2898 }
0x2246   :  { %v1667_v48 = vadd.f32 1.0, %v2899_v47 }
0x2248   :  { %2900 = vrcp.f32 %v1667_v48 }
0x2252   :  { %v2901_v49 = vpop.eup %2900 }
0x2253   :  { %v1674_v14 = vmul.f32 %v2901_v49, %v1672_v52 }
0x22b6   :  { %v1677_v50 = vpop.permute.xlu1 %1676 }
0x22b7   :  { %v1679_v51 = vmul.f32 %v2901_v49, %v1677_v50 }
0x22b9   :  { %1681 = vrot.lane.b32.xlu0 %v1679_v51, %s3087_s6 }
0x232b   :  { %v1682_v54 = vpop.permute.xlu0 %1681 }
0x232c   :  { %v1684_v55 = vadd.f32 %v1682_v54, %v1674_v14 }
0x232e   :  { %2902 = vtanh.f32 %v1684_v55 }
0x2338   :  { %v2903_v56 = vpop.eup %2902 }
0x2339   :  { %1687 = vrot.lane.b32.xlu1 %v2903_v56, %s3087_s6 }
0x23ab   :  { %v1688_v57 = vpop.permute.xlu1 %1687 }
0x23ac   :  { %v3499_v58 = vmul.f32 %v2901_v49, %v1688_v57 }
0x23ae   :  { %1692 = vrot.lane.b32.xlu0 %v3499_v58, %s3088_s5 }
0x2420   :  { %v1693_v59 = vpop.permute.xlu0 %1692 }
0x2421   :  { %2607 = vmatmul.mubr.msk.f32.vlgmr.msra.gmra.mrb[14].mxu1 %vm206_vm3, %v1693_v59  ;;  %v2039_v59 = vld [vmem:[#allocation8 + $0x8] sm:$0xff] }
0x2422   :  { %2757 = vmatpush3.bf16.msra.mxu1 %v3396_v62  ;;  %2628 = vmatprep.mubr.msk.f32.mxu1 %vm3085_vm0, %v3086_v1 }
0x2423   :  { %2758 = vmatprep.subr.bf16.mxu1 %v3084_v0  ;;  %v1778_v0 = vrot.slane %v1684_v55, 6 }
0x2426   :  { %2760 = vmatpush3.bf16.msra.mxu1 %v3399_v2 }
0x24f4   :  { %v1762_v60 = vpop.f32.mrb[14].mxu1 }
0x24f5   :  { %v1767_v61 = vrot.slane %v1762_v60, 6  ;;  %v2608_v38 = vpop.f32.mrb[15].mxu1 }
0x24f7   :  { %v1769_v63 = vadd.f32 %v1767_v61, %v3435_v17  ;;  %v2041_v61 = vld [vmem:[#allocation8 + $0x18] sm:$0xff] }
0x24f9   :  { %2904 = vtanh.f32 %v1769_v63  ;;  %v2325_v3 = vmul.f32 -1.442695, %v1769_v63 }
0x24fb   :  { %2906 = vpow2.f32 %v2325_v3 }
0x2503   :  { %v2905_v5 = vpop.eup %2904 }
0x2504   :  { %1782 = vrot.lane.b32.xlu1 %v2905_v5, %s3087_s6 }
0x2505   :  { %v2907_v4 = vpop.eup %2906 }
0x2506   :  { %v1773_v62 = vadd.f32 1.0, %v2907_v4 }
0x2508   :  { %2908 = vrcp.f32 %v1773_v62 }
0x2512   :  { %v2909_v6 = vpop.eup %2908 }
0x2513   :  { %v1780_v2 = vmul.f32 %v2909_v6, %v1778_v0 }
0x2576   :  { %v1783_v1 = vpop.permute.xlu1 %1782 }
0x2577   :  { %v1785_v7 = vmul.f32 %v2909_v6, %v1783_v1  ;;  %v2148_v1 = vld [vmem:[%s3621_s11] sm:$0xff] }
0x2579   :  { %1787 = vrot.lane.b32.xlu0 %v1785_v7, %s3087_s6  ;;  %v2149_v7 = vld [vmem:[%s3621_s11 + $0x8] sm:$0xff] }
0x257a   :  { %v2769_v0 = vpack.c.bf16 %v2149_v7, %v2148_v1 }
0x257c   :  { %2770 = vmatprep.subr.bf16.mxu1 %v2769_v0 }
0x25eb   :  { %v1788_v8 = vpop.permute.xlu0 %1787 }
0x25ec   :  { %v1790_v9 = vadd.f32 %v1788_v8, %v1780_v2  ;;  %v2150_v2 = vld [vmem:[%s3621_s11 + $0x10] sm:$0xff]  ;;  %v2151_v8 = vld [vmem:[%s3621_s11 + $0x18] sm:$0xff] }
0x25ee   :  { %2910 = vtanh.f32 %v1790_v9  ;;  %v1885_v31 = vrot.slane %v1790_v9, 6  ;;  %v2152_v9 = vld [vmem:[%s3621_s11 + $0x20] sm:$0xff] }
0x25f8   :  { %v2911_v11 = vpop.eup %2910 }
0x25f9   :  { %1793 = vrot.lane.b32.xlu1 %v2911_v11, %s3087_s6  ;;  %v2773_v11 = vpack.c.bf16 %v2151_v8, %v2150_v2 }
0x266b   :  { %v1794_v12 = vpop.permute.xlu1 %1793 }
0x266c   :  { %v1796_v13 = vmul.f32 %v2909_v6, %v1794_v12  ;;  %v2153_v12 = vld [vmem:[%s3621_s11 + $0x28] sm:$0x1f] }
0x266e   :  { %v1798_v15 = vrot.slane %v1796_v13, 2  ;;  %v2014_v36 = vsel %vm1053_vm4, %v3499_v58, %v1796_v13  ;;  %v2038_v58 = vld [vmem:[#allocation8] sm:$0xff]  ;;  %v2777_v13 = vpack.c.bf16 %v2153_v12, %v2152_v9 }
0x2670   :  { %1799 = vrot.lane.b32.xlu0 %v1798_v15, %s3088_s5  ;;  %v2137_v15 = vlaneseq }
0x26e2   :  { %v1800_v18 = vpop.permute.xlu0 %1799 }
0x26e3   :  { %2618 = vmatmul.mubr.msk.f32.vlgmr.msra.gmra.mrb[16].mxu0 %vm206_vm3, %v1800_v18  ;;  %v2134_v18 = vld [vmem:[%s3622_s12] sm:$0x1] }
0x26e4   :  { %vm2135_vm10 = vcmp.gt.f32.partialorder %v2134_v18, 0.5 }
0x27b6   :  { %v1869_v20 = vpop.f32.mrb[16].mxu0 }
0x27b7   :  { %v1874_v21 = vrot.slane %v1869_v20, 4  ;;  %v2619_v22 = vpop.f32.mrb[17].mxu0  ;;  %v2138_v20 = vshrl.u32 %v2137_v15, 7 }
0x27b8   :  { %v3091_v22 = vmov 0  }
0x27b9   :  { %v1876_v23 = vadd.f32 %v1874_v21, %v3435_v17  ;;  %v2139_v21 = vsub.s32 0, %v2138_v20 }
0x27bb   :  { %2912 = vtanh.f32 %v1876_v23  ;;  %v2327_v25 = vmul.f32 -1.442695, %v1876_v23  ;;  %v2136_v23 = vsel %vm2135_vm10, 1, %v3091_v22 }
0x27bd   :  { %2914 = vpow2.f32 %v2327_v25  ;;  %v2330_v25 = vld [vmem:[%s3620_s10] ss:$0 sm:$0xff]  ;;  %s3092_s10 = smov [#allocation10]  }
0x27be   :  { %s2257_s12 = sshll.u32 %s3092_s10, 4  ;;  %s2258_s12 = int_to_ptr.vmem [resolvable:$true] %s2257_s12 }
0x27bf   :  { %s3024_s18 = scalar_lea.vmem %s2258_s12, 64  ;;  %p3029_p5 = scmp.lt.s32.totalorder %s2258_s12, %s2258_s12 }
0x27c0   :  { %p3025_p4 = scmp.ne.s32.totalorder %s2258_s12, %s3024_s18  ;;  %p3030_p6 = scmp.lt.s32.totalorder %s3024_s18, %s3024_s18 }
0x27c2   :  { %p3031_p7 = por %p3030_p6, %p3029_p5 }
0x27c4   :  { %p3032_p8 = pnand %p3031_p7, %p3025_p4 }
0x27c5   :  { %v2913_v24 = vpop.eup %2912 }
0x27c6   :  { %1889 = vrot.lane.b32.xlu1 %v2913_v24, %s3087_s6  ;;  %v2140_v24 = vrot.slane %v2136_v23, %v2139_v21 }
0x27c7   :  { %v2915_v26 = vpop.eup %2914 }
0x27c8   :  { %v1880_v27 = vadd.f32 1.0, %v2915_v26  ;;  %vm2141_vm11 = vcmp.eq.s32.totalorder %v2140_v24, 1 }
0x27ca   :  { %2916 = vrcp.f32 %v1880_v27 }
0x27d4   :  { %v2917_v28 = vpop.eup %2916 }
0x27d5   :  { %v1887_v32 = vmul.f32 %v2917_v28, %v1885_v31 }
0x2838   :  { %v1890_v29 = vpop.permute.xlu1 %1889 }
0x2839   :  { %v1892_v30 = vmul.f32 %v2917_v28, %v1890_v29 }
0x283b   :  { %1894 = vrot.lane.b32.xlu0 %v1892_v30, %s3087_s6 }
0x28ad   :  { %v1895_v33 = vpop.permute.xlu0 %1894 }
0x28ae   :  { %v1897_v34 = vadd.f32 %v1895_v33, %v1887_v32 }
0x28b0   :  { %2918 = vtanh.f32 %v1897_v34 }
0x28ba   :  { %v2919_v16 = vpop.eup %2918 }
0x28bb   :  { %1900 = vrot.lane.b32.xlu1 %v2919_v16, %s3087_s6 }
0x292d   :  { %v1901_v35 = vpop.permute.xlu1 %1900 }
0x292e   :  { %v1903_v19 = vmul.f32 %v2917_v28, %v1901_v35 }
0x2930   :  { %v1905_v37 = vrot.slane %v1903_v19, 4  ;;  %v2015_v39 = vsel %vm121_vm1, %v2014_v36, %v1903_v19 }
0x2932   :  { %1906 = vrot.lane.b32.xlu0 %v1905_v37, %s3088_s5 }
0x29a4   :  { %v1907_v41 = vpop.permute.xlu0 %1906 }
0x29a5   :  { %2629 = vmatmul.mubr.msk.f32.vlgmr.msra.gmra.mrb[16].mxu1 %vm206_vm3, %v1907_v41 }
0x29a6   :  { %2772 = vmatpush3.bf16.msra.mxu1 %v2769_v0 }
0x29a7   :  { %2774 = vmatprep.subr.bf16.mxu1 %v2773_v11 }
0x29aa   :  { %2776 = vmatpush3.bf16.msra.mxu1 %v2773_v11 }
0x29ab   :  { %2779 = vmatprep.subr.msk.bf16.mxu1 %vm2778_vm9, %v2777_v13 }
0x29ae   :  { %2782 = vmatpush3.bf16.msk.msra.mxu1 %vm2778_vm9, %v2777_v13 }
0x2a78   :  { %v1976_v42 = vpop.f32.mrb[16].mxu1 }
0x2a79   :  { %v1981_v43 = vrot.slane %v1976_v42, 2  ;;  %v2630_v44 = vpop.f32.mrb[17].mxu1 }
0x2a7b   :  { %v1983_v45 = vadd.f32 %v1981_v43, %v3435_v17  ;;  %v1992_v17 = vrot.slane %v1897_v34, 6 }
0x2a7d   :  { %2920 = vtanh.f32 %v1983_v45  ;;  %v2329_v47 = vmul.f32 -1.442695, %v1983_v45 }
0x2a7f   :  { %2922 = vpow2.f32 %v2329_v47 }
0x2a87   :  { %v2921_v46 = vpop.eup %2920 }
0x2a88   :  { %1996 = vrot.lane.b32.xlu1 %v2921_v46, %s3087_s6 }
0x2a89   :  { %v2923_v48 = vpop.eup %2922 }
0x2a8a   :  { %v1987_v49 = vadd.f32 1.0, %v2923_v48 }
0x2a8c   :  { %2924 = vrcp.f32 %v1987_v49 }
0x2a96   :  { %v2925_v50 = vpop.eup %2924 }
0x2a97   :  { %v1994_v14 = vmul.f32 %v2925_v50, %v1992_v17 }
0x2afa   :  { %v1997_v51 = vpop.permute.xlu1 %1996 }
0x2afb   :  { %v1999_v52 = vmul.f32 %v2925_v50, %v1997_v51 }
0x2afd   :  { %2001 = vrot.lane.b32.xlu0 %v1999_v52, %s3087_s6 }
0x2b01   :  { %2051 = vrot.lane.b32.xlu0 %v3486_v40, %s3088_s5 }
0x2b05   :  { %2019 = vrot.lane.b32.xlu0 %v3416_v10, %s3088_s5  ;;  %v2040_v10 = vld [vmem:[#allocation8 + $0x10] sm:$0xff] }
0x2b06   :  { %v2765_v38 = vpack.c.bf16 %v2041_v61, %v2040_v10 }
0x2b09   :  { %2030 = vrot.lane.b32.xlu0 %v3392_v53, %s3089_s8  ;;  %v2761_v53 = vpack.c.bf16 %v2039_v59, %v2038_v58 }
0x2b0b   :  { %2762 = vmatprep.subr.bf16.mxu0 %v2761_v53 }
0x2b0c   :  { %2764 = vmatpush3.bf16.msra.mxu0 %v2761_v53 }
0x2b0d   :  { %2766 = vmatprep.subr.bf16.mxu0 %v2765_v38 }
0x2b10   :  { %2768 = vmatpush3.bf16.msra.mxu0 %v2765_v38 }
0x2b6f   :  { %v2002_v54 = vpop.permute.xlu0 %2001 }
0x2b70   :  { %v2004_v55 = vadd.f32 %v2002_v54, %v1994_v14 }
0x2b72   :  { %2926 = vtanh.f32 %v2004_v55 }
0x2b73   :  { %v2052_v56 = vpop.permute.xlu0 %2051 }
0x2b74   :  { %2639 = vmatprep.mubr.msk.f32.mxu0 %vm206_vm3, %v2052_v56 }
0x2b77   :  { %v2020_v57 = vpop.permute.xlu0 %2019 }
0x2b78   :  { %2026 = vst.msk [vmem:[#allocation10 - $0x6] sm:$0xc0] %vm2025_vm6, %v2020_v57 }
0x2b7b   :  { %v2031_v40 = vpop.permute.xlu0 %2030 }
0x2b7c   :  { %v2927_v60 = vpop.eup %2926  ;;  %2036 = vst.msk [vmem:[#allocation11 - $0x6] sm:$0xc0] %vm2025_vm6, %v2031_v40 }
0x2b7d   :  { %2007 = vrot.lane.b32.xlu1 %v2927_v60, %s3087_s6 }
0x2bef   :  { %v2008_v63 = vpop.permute.xlu1 %2007 }
0x2bf0   :  { %v2010_v5 = vmul.f32 %v2925_v50, %v2008_v63 }
0x2bf2   :  { %v2016_v3 = vsel %vm1056_vm5, %v2015_v39, %v2010_v5 }
0x2bf3   :  { %2053 = vrot.lane.b32.xlu1 %v2016_v3, %s3088_s5 }
0x2bf7   :  { %2021 = vrot.lane.b32.xlu1 %v2010_v5, %s3088_s5  ;;  %s2269_s5 = sshll.u32 %s3093_s29, 4  ;;  %s2270_s5 = int_to_ptr.vmem [resolvable:$true] %s2269_s5 }
0x2bfb   :  { %2032 = vrot.lane.b32.xlu1 %v2004_v55, %s3089_s8 }
0x2c65   :  { %v2054_v4 = vpop.permute.xlu1 %2053 }
0x2c66   :  { %2640 = vmatmul.mubr.msk.f32.vlgmr.msra.gmra.mrb[18].mxu0 %vm206_vm3, %v2054_v4 }
0x2c69   :  { %v2022_v62 = vpop.permute.xlu1 %2021 }
0x2c6a   :  { %2027 = vst.msk [vmem:[#allocation10 - $0x4] sm:$0xc0] %vm2025_vm6, %v2022_v62 }
0x2c6d   :  { %v2033_v6 = vpop.permute.xlu1 %2032 }
0x2c6e   :  { %2037 = vst.msk [vmem:[#allocation11 - $0x4] sm:$0xc0] %vm2025_vm6, %v2033_v6 }
0x2d39   :  { %v2641_v26 = vpop.f32.mrb[18].mxu0 }
0x2d3a   :  { %v2131_v27 = vadd.f32 %v2641_v26, %v2330_v25  ;;  %v2125_v28 = vpop.f32.mrb[19].mxu0 }
0x2d3b   :  { %v2126_v29 = vadd.f32 %v2330_v25, %v2125_v28 }
0x2d3c   :  { %v2143_v30 = vsel %vm2141_vm11, %v2131_v27, -1e+30 }
0x2d3d   :  { %v2146_v31 = vmul.f32 1.442695, %v2143_v30  ;;  %v2142_v32 = vsel %vm2141_vm11, %v2126_v29, -1e+30 }
0x2d3e   :  { %v2144_v33 = vmul.f32 1.442695, %v2142_v32 }
0x2d40   :  { %2928 = vpow2.f32 %v2144_v33 }
0x2d41   :  { %2930 = vpow2.f32 %v2146_v31 }
0x2d4a   :  { %v2929_v34 = vpop.eup %2928 }
0x2d4b   :  { %v2931_v16 = vpop.eup %2930  ;;  %2654 = vmatprep.mubr.msk.f32.mxu1 %vm2154_vm12, %v2929_v34 }
0x2d4c   :  { %2655 = vmatmul.mubr.msk.f32.vlgmr.msra.gmra.mrb[18].mxu1 %vm2154_vm12, %v2931_v16 }
0x2d4d   :  { %3035 = shalt.err (!%p3032_p8)
}
0x2d4e   :  { %s3036_s23 = scalar_lea.hbm %s3624_s14, 64 }
0x2d4f   :  { %p3037_p9 = scmp.ne.s32.totalorder %s3624_s14, %s3036_s23  ;;  %p3040_p10 = scmp.lt.u32.totalorder %s3036_s23, %s3624_s14 }
0x2d51   :  { %p3042_p11 = pnand %p3040_p10, %p3037_p9 }
0x2d53   :  { %3045 = shalt.err (!%p3042_p11)
}
0x2d54   :  { %s3094_s26 = smov 2   ;;  %s3046_s27 = scalar_lea.vmem %s2270_s5, 64 }
0x2d55   :  { %2263 = dma.vmem_to_hbm [thread:$0]  %s2258_s12, 64, %s3624_s14, [#allocation4], %s3087_s6, %s3087_s6, %s3094_s26  }
0x2d56   :  { %p3047_p12 = scmp.ne.s32.totalorder %s2270_s5, %s3046_s27  ;;  %p3051_p13 = scmp.lt.s32.totalorder %s2270_s5, %s2270_s5 }
0x2d57   :  { %p3052_p0 = scmp.lt.s32.totalorder %s3046_s27, %s3046_s27 }
0x2d59   :  { %p3053_p1 = por %p3052_p0, %p3051_p13 }
0x2d5b   :  { %p3054_p2 = pnand %p3053_p1, %p3047_p12 }
0x2d5d   :  { %3057 = shalt.err (!%p3054_p2)
}
0x2d5e   :  { %s3058_s16 = scalar_lea.hbm %s3625_s15, 64 }
0x2d5f   :  { %p3059_p3 = scmp.ne.s32.totalorder %s3625_s15, %s3058_s16  ;;  %p3062_p4 = scmp.lt.u32.totalorder %s3058_s16, %s3625_s15 }
0x2d61   :  { %p3064_p5 = pnand %p3062_p4, %p3059_p3 }
0x2d63   :  { %3067 = shalt.err (!%p3064_p5)
}
0x2d64   :  { %2275 = dma.vmem_to_hbm [thread:$0]  %s2270_s5, 64, %s3625_s15, [#allocation12], %s3087_s6, %s3087_s6, %s3094_s26  }
0x2e1f   :  { %v2656_v35 = vpop.f32.mrb[18].mxu1 }
0x2e20   :  { %v2241_v19 = vsel %vm2141_vm11, %v2656_v35, 1.0  ;;  %v2231_v36 = vpop.f32.mrb[19].mxu1 }
0x2e21   :  { %2932 = vlog2.f32 %v2241_v19  ;;  %v2240_v37 = vsel %vm2141_vm11, %v2231_v36, 1.0 }
0x2e22   :  { %2934 = vlog2.f32 %v2240_v37 }
0x2e2b   :  { %v2933_v39 = vpop.eup %2932 }
0x2e2c   :  { %v2935_v41 = vpop.eup %2934  ;;  %v2245_v42 = vmul.f32 0.6931472, %v2933_v39 }
0x2e2d   :  { %v2243_v43 = vmul.f32 0.6931472, %v2935_v41 }
0x2e2e   :  { %v2247_v44 = vsub.f32 %v2131_v27, %v2245_v42 }
0x2e2f   :  { %v2246_v45 = vsub.f32 %v2126_v29, %v2243_v43 }
0x2e30   :  { %2249 = vst.msk [vmem:[%s3623_s13 + $0x8] sm:$0xff] %vm2154_vm12, %v2247_v44 }
0x2e31   :  { %2248 = vst.msk [vmem:[%s3623_s13] sm:$0xff] %vm2154_vm12, %v2246_v45 }
0x2e32   :  { %3074 = dma.done.wait [#allocation4], 64  }
0x2e33   :  { %3075 = vsyncadd [#allocation4], 4294967232 }
0x2e34   :  { %3076 = dma.done.wait [#allocation12], 64  }
0x2e35   :  { %3077 = vsyncadd [#allocation12], 4294967232 }
0x2e36   :  { %2284 = vsyncpa [#allocation3], 1 }
0x2e37   :  { %2285 = vsyncpa [#allocation6], 1 }
0x2e38   :  { %2286 = vsyncpa [#allocation9], 1 }
0x2e39   :  { %2287 = vsyncpa [#allocation4], 1 }
0x2e3a   :  { %2288 = vsyncpa [#allocation12], 1 }

</bundles_post_ra>
